<compile_context>
chip_gen: v7x
topology: tpu7x:2x2x1
jax: 0.10.0
libtpu: 0.0.40
codegen_flags: <defaults>
</compile_context>

<pallas_src>
import functools

import jax
import jax.numpy as jnp
import numpy as np
from jax.experimental import pallas as pl
from jax.experimental.pallas import tpu as pltpu


def _round_up(x, m):
    return (x + m - 1) // m * m


def _vmem_limit_bytes():
    """Generation-aware VMEM ceiling with headroom for compiler scratch."""
    cap = None
    try:
        cap = getattr(pltpu.get_tpu_info(), "vmem_capacity_bytes", None)
    except Exception:
        cap = None
    if not cap:
        cap = 64 * 1024 * 1024  # conservative default (v7x per-core VMEM)
    return int(min(max(cap - 16 * 1024 * 1024, 32 * 1024 * 1024),
                   112 * 1024 * 1024))


def _num_tensorcores():
    """Best-effort TensorCores-per-device (2 on v7x megacore, else 1)."""
    try:
        info = pltpu.get_tpu_info()
        for name in ("num_cores", "tensorcore_count", "core_count"):
            v = getattr(info, name, None)
            if v:
                return int(v)
    except Exception:
        pass
    try:
        d = jax.devices()[0]
        for name in ("num_cores", "core_count"):
            v = getattr(d, name, None)
            if v:
                return int(v)
    except Exception:
        pass
    return 1


# ----------------------------------------------------------------------------
# Tiled matmul + bias kernel: used only for the final Linear head.
# ----------------------------------------------------------------------------
def _matmul_bias_kernel(x_ref, w_ref, b_ref, o_ref):
    o_ref[...] = (
        jnp.dot(x_ref[...].astype(w_ref.dtype), w_ref[...],
                preferred_element_type=jnp.float32)
        + b_ref[...]
    ).astype(o_ref.dtype)


def matmul_bias(x, w, b, *, out_dtype=jnp.float32):
    """x: (N, K), w: (K, O) bf16 (O multiple of 128), b: (1, O) f32."""
    N, K = x.shape
    O = w.shape[1]
    vmem = _vmem_limit_bytes()
    # VMEM budget: double-buffered x / out blocks + double-buffered weight + bias.
    fixed = 2 * K * O * w.dtype.itemsize + 2 * O * 4
    per_row = 2 * (K * x.dtype.itemsize + O * jnp.dtype(out_dtype).itemsize)
    rb_cap = max(8, ((int(vmem * 0.85) - fixed) // max(per_row, 1)) // 8 * 8)
    rb = max(8, min(_round_up(N, 8), rb_cap, 1024))
    N_pad = _round_up(N, rb)
    if N_pad != N:
        x = jnp.pad(x, ((0, N_pad - N), (0, 0)))
    out = pl.pallas_call(
        _matmul_bias_kernel,
        out_shape=jax.ShapeDtypeStruct((N_pad, O), out_dtype),
        grid_spec=pltpu.PrefetchScalarGridSpec(
            num_scalar_prefetch=0,
            grid=(N_pad // rb,),
            in_specs=[
                pl.BlockSpec((rb, K), lambda i: (i, 0)),   # activations (streamed)
                pl.BlockSpec((K, O), lambda i: (0, 0)),    # weight (constant index)
                pl.BlockSpec((1, O), lambda i: (0, 0)),    # bias
            ],
            out_specs=pl.BlockSpec((rb, O), lambda i: (i, 0)),
        ),
        compiler_params=pltpu.CompilerParams(
            dimension_semantics=("parallel",),
            vmem_limit_bytes=vmem,
        ),
    )(x, w, b)
    return out[:N] if N_pad != N else out


# ----------------------------------------------------------------------------
# Fused RNN layer kernel.  Layer input sequence x (time-major, bf16) is read
# block-by-block; per timestep the kernel computes
#     h = tanh(x_t @ W_ih^T + h @ W_hh^T + (b_ih + b_hh))
# Grid = (batch tiles [parallel], time blocks [arbitrary]); the hidden state is
# carried across time blocks in a bf16 VMEM scratch.  f32 accumulation via
# preferred_element_type; bias add + tanh in f32; single bf16 cast per step.
# ----------------------------------------------------------------------------
def _rnn_layer_kernel(x_ref, wih_ref, whh_ref, bias_ref, out_ref, h_ref):
    t = pl.program_id(1)

    @pl.when(t == 0)
    def _():
        h_ref[...] = jnp.zeros_like(h_ref)  # h0 = zeros, per PyTorch forward

    w_ih = wih_ref[...]   # (K, H_pad) bf16, constant across the grid
    w_hh = whh_ref[...]   # (H_pad, H_pad) bf16
    bias = bias_ref[...]  # (1, H_pad) f32
    t_blk = x_ref.shape[0]

    def step(i, h):
        # Input projection is independent of h -> overlaps the serial chain.
        gi = jnp.dot(x_ref[i], w_ih, preferred_element_type=jnp.float32)
        gh = jnp.dot(h, w_hh, preferred_element_type=jnp.float32)
        h_new = jnp.tanh(gi + gh + bias).astype(out_ref.dtype)
        out_ref[i] = h_new
        return h_new

    h_ref[...] = jax.lax.fori_loop(0, t_blk, step, h_ref[...],
                                   unroll=min(8, t_blk))


def rnn_layer(x_tm, w_ih_t, w_hh_t, bias, *, b_blk, t_blk, vmem_limit):
    """x_tm: (T_pad, B_pad, K) bf16 -> hidden sequence (T_pad, B_pad, H_pad) bf16."""
    T_pad, B_pad, K = x_tm.shape
    H_pad = w_hh_t.shape[0]
    nb, nt = B_pad // b_blk, T_pad // t_blk
    return pl.pallas_call(
        _rnn_layer_kernel,
        out_shape=jax.ShapeDtypeStruct((T_pad, B_pad, H_pad), jnp.bfloat16),
        grid_spec=pltpu.PrefetchScalarGridSpec(
            num_scalar_prefetch=0,
            grid=(nb, nt),
            in_specs=[
                pl.BlockSpec((t_blk, b_blk, K), lambda b, t: (t, b, 0)),  # x block
                pl.BlockSpec((K, H_pad), lambda b, t: (0, 0)),            # W_ih^T
                pl.BlockSpec((H_pad, H_pad), lambda b, t: (0, 0)),        # W_hh^T
                pl.BlockSpec((1, H_pad), lambda b, t: (0, 0)),            # bias
            ],
            out_specs=pl.BlockSpec((t_blk, b_blk, H_pad), lambda b, t: (t, b, 0)),
            scratch_shapes=[pltpu.VMEM((b_blk, H_pad), jnp.bfloat16)],
        ),
        compiler_params=pltpu.CompilerParams(
            # time axis must stay sequential; batch-tile axis can be sharded.
            dimension_semantics=("parallel", "arbitrary"),
            vmem_limit_bytes=vmem_limit,
        ),
    )(x_tm, w_ih_t, w_hh_t, bias)


# ----------------------------------------------------------------------------
# VMEM-budget-driven block sizing (shared by all layers).
# ----------------------------------------------------------------------------
def _choose_blocks(T, B, K_max, H_pad, vmem_limit, num_cores):
    b8 = _round_up(B, 8)
    b_cap = 256
    if num_cores > 1 and b8 >= 16:
        # >=2 batch tiles so the "parallel" axis shards across TensorCores (v7x).
        b_cap = min(b_cap, _round_up(pl.cdiv(b8, num_cores), 8))
    b_blk = min(b8, b_cap)
    B_pad = _round_up(B, b_blk)

    budget = int(vmem_limit * 0.85)
    # Weights/bias (double-buffered by the default pipeline) + bf16 h scratch.
    fixed = (2 * (K_max * H_pad + H_pad * H_pad) * 2
             + 2 * H_pad * 4
             + b_blk * H_pad * 2)
    # Per-timestep-of-block cost: bf16 x block + bf16 out block, double-buffered.
    per_t = 2 * b_blk * (K_max + H_pad) * 2
    t_blk = int(max(1, min((budget - fixed) // max(per_t, 1), 32, T)))
    T_pad = _round_up(T, t_blk)
    return b_blk, B_pad, t_blk, T_pad


# ----------------------------------------------------------------------------
# Full model forward (glue in plain JAX).
# ----------------------------------------------------------------------------
@functools.partial(jax.jit, static_argnames=("output_dim", "last_timestep_only"))
def rnn_model_forward(x, params, output_dim, last_timestep_only=False):
    """x: (B, T, input_dim) f32. Returns (B, T, output_dim) or (B, output_dim)."""
    B, T, D = x.shape
    H_pad = params["rnn"][0]["w_hh_t"].shape[0]
    K_max = max(D, H_pad) if len(params["rnn"]) > 1 else D
    vmem_limit = _vmem_limit_bytes()
    b_blk, B_pad, t_blk, T_pad = _choose_blocks(
        T, B, K_max, H_pad, vmem_limit, _num_tensorcores())

    # Time-major bf16 layout for the whole stack; zero-pad time + batch.
    # (Padded trailing timesteps come AFTER the real ones -> never affect them.)
    h_seq = jnp.transpose(x, (1, 0, 2)).astype(jnp.bfloat16)       # (T, B, D)
    h_seq = jnp.pad(h_seq, ((0, T_pad - T), (0, B_pad - B), (0, 0)))

    for layer in params["rnn"]:
        # One fused pallas_call per layer: input projection + recurrence.
        h_seq = rnn_layer(h_seq, layer["w_ih_t"], layer["w_hh_t"], layer["bias"],
                          b_blk=b_blk, t_blk=t_blk, vmem_limit=vmem_limit)
        # TODO(synk): dropout between layers skipped (eval-mode semantics).

    if last_timestep_only:
        feat = h_seq[T - 1]                                        # (B_pad, H_pad)
        y = matmul_bias(feat, params["fc_w_t"], params["fc_b"])    # (B_pad, O_pad)
        return y[:B, :output_dim]
    else:
        y = matmul_bias(h_seq.reshape(T_pad * B_pad, H_pad),
                        params["fc_w_t"], params["fc_b"])          # (T_pad*B_pad, O_pad)
        y = y.reshape(T_pad, B_pad, -1)[:T, :B, :output_dim]
        return jnp.transpose(y, (1, 0, 2))                         # (B, T, O)


# ----------------------------------------------------------------------------
# Parameter init (PyTorch nn.RNN / nn.Linear layout) + conversion to the
# padded / transposed / bf16 kernel layout.
# ----------------------------------------------------------------------------
def init_torch_style_params(key, input_dim, hidden_dim, layer_dim, output_dim):
    k = 1.0 / np.sqrt(hidden_dim)
    rnn = []
    for l in range(layer_dim):
        d_in = input_dim if l == 0 else hidden_dim
        key, k1, k2, k3, k4 = jax.random.split(key, 5)
        w_ih = jax.random.uniform(k1, (hidden_dim, d_in), jnp.float32, -k, k)
        w_hh = jax.random.uniform(k2, (hidden_dim, hidden_dim), jnp.float32, -k, k)
        b_ih = jax.random.uniform(k3, (hidden_dim,), jnp.float32, -k, k)
        b_hh = jax.random.uniform(k4, (hidden_dim,), jnp.float32, -k, k)
        rnn.append((w_ih, w_hh, b_ih, b_hh))
    key, k1, k2 = jax.random.split(key, 3)
    fc_w = jax.random.uniform(k1, (output_dim, hidden_dim), jnp.float32, -k, k)
    fc_b = jax.random.uniform(k2, (output_dim,), jnp.float32, -k, k)
    return dict(rnn=rnn, fc_w=fc_w, fc_b=fc_b)


def convert_params(tp, input_dim, hidden_dim, output_dim):
    H_pad = _round_up(hidden_dim, 128)
    O_pad = _round_up(output_dim, 128)
    layers = []
    for l, (w_ih, w_hh, b_ih, b_hh) in enumerate(tp["rnn"]):
        d_in = w_ih.shape[1]
        in_rows = d_in if l == 0 else H_pad  # layer >0 consumes H_pad-wide activations
        w_ih_t = jnp.zeros((in_rows, H_pad), jnp.float32).at[:d_in, :hidden_dim].set(w_ih.T)
        w_hh_t = jnp.zeros((H_pad, H_pad), jnp.float32).at[:hidden_dim, :hidden_dim].set(w_hh.T)
        bias = jnp.zeros((1, H_pad), jnp.float32).at[0, :hidden_dim].set(b_ih + b_hh)
        layers.append(dict(
            w_ih_t=w_ih_t.astype(jnp.bfloat16),
            w_hh_t=w_hh_t.astype(jnp.bfloat16),
            bias=bias,
        ))
    fc_w_t = jnp.zeros((H_pad, O_pad), jnp.float32).at[:hidden_dim, :output_dim].set(tp["fc_w"].T)
    fc_b = jnp.zeros((1, O_pad), jnp.float32).at[0, :output_dim].set(tp["fc_b"])
    return dict(rnn=layers, fc_w_t=fc_w_t.astype(jnp.bfloat16), fc_b=fc_b)


# ----------------------------------------------------------------------------
# Pure-JAX f32 reference (PyTorch semantics) for a sanity check.
# ----------------------------------------------------------------------------
def reference_forward(x, tp, last_timestep_only=False):
    B, T, _ = x.shape
    h_seq = x.astype(jnp.float32)
    for (w_ih, w_hh, b_ih, b_hh) in tp["rnn"]:
        H = w_hh.shape[0]

        def step(h, x_t, w_ih=w_ih, w_hh=w_hh, b_ih=b_ih, b_hh=b_hh):
            h_new = jnp.tanh(x_t @ w_ih.T + b_ih + h @ w_hh.T + b_hh)
            return h_new, h_new

        h0 = jnp.zeros((B, H), jnp.float32)
        _, ys = jax.lax.scan(step, h0, jnp.transpose(h_seq, (1, 0, 2)))
        h_seq = jnp.transpose(ys, (1, 0, 2))
    if last_timestep_only:
        h_seq = h_seq[:, -1, :]
    return h_seq @ tp["fc_w"].T + tp["fc_b"]


if __name__ == "__main__":
    B, T = 2, 8
    input_dim, hidden_dim, layer_dim, output_dim = 4, 32, 2, 8

    key = jax.random.PRNGKey(0)
    key, kx, kp = jax.random.split(key, 3)
    x = jax.random.normal(kx, (B, T, input_dim), jnp.float32)
    torch_params = init_torch_style_params(kp, input_dim, hidden_dim, layer_dim, output_dim)
    params = convert_params(torch_params, input_dim, hidden_dim, output_dim)

    # Full-sequence path.
    out = rnn_model_forward(x, params, output_dim=output_dim, last_timestep_only=False)
    out = jax.block_until_ready(out)
    assert out.shape == (B, T, output_dim), out.shape

    ref = reference_forward(x, torch_params, last_timestep_only=False)
    ref = jax.block_until_ready(ref)
    # bf16 weights / activations vs f32 reference -> widened tolerance.
    np.testing.assert_allclose(np.asarray(out), np.asarray(ref), rtol=5e-2, atol=5e-2)

    # Last-timestep-only path.
    out_last = rnn_model_forward(x, params, output_dim=output_dim, last_timestep_only=True)
    out_last = jax.block_until_ready(out_last)
    assert out_last.shape == (B, output_dim), out_last.shape
    ref_last = reference_forward(x, torch_params, last_timestep_only=True)
    np.testing.assert_allclose(np.asarray(out_last), np.asarray(ref_last), rtol=5e-2, atol=5e-2)

    print("KERNEL_OK")
</pallas_src>

<mosaic_0001>
module attributes {stable_mosaic.version = 11 : i64} {
  func.func @_rnn_layer_kernel(%arg0: i32, %arg1: i32, %arg2: memref<8x8x4xbf16, #tpu.memory_space<vmem>>, %arg3: memref<4x128xbf16, #tpu.memory_space<vmem>>, %arg4: memref<128x128xbf16, #tpu.memory_space<vmem>>, %arg5: memref<1x128xf32, #tpu.memory_space<vmem>>, %arg6: memref<8x8x128xbf16, #tpu.memory_space<vmem>>, %arg7: memref<8x128xbf16, #tpu.memory_space<vmem>>) attributes {dimension_semantics = [#tpu.dimension_semantics<parallel>, #tpu.dimension_semantics<arbitrary>], iteration_bounds = array<i64: 1, 1>, scalar_prefetch = 0 : i64, scratch_operands = 1 : i64, tpu.core_type = #tpu.core_type<tc>, window_params = [{transform_indices = @transform_0, window_bounds = array<i64: 8, 8, 4>}, {pipeline_mode = #tpu.pipeline_mode<synchronous>, transform_indices = @transform_1, window_bounds = array<i64: 4, 128>}, {pipeline_mode = #tpu.pipeline_mode<synchronous>, transform_indices = @transform_2, window_bounds = array<i64: 128, 128>}, {pipeline_mode = #tpu.pipeline_mode<synchronous>, transform_indices = @transform_3, window_bounds = array<i64: 1, 128>}, {transform_indices = @transform_4, window_bounds = array<i64: 8, 8, 128>}]} {
    %c0_i32 = arith.constant 0 : i32
    %0 = arith.cmpi eq, %arg1, %c0_i32 : i32
    %1 = arith.extui %0 : i1 to i32
    %c0_i32_0 = arith.constant 0 : i32
    %2 = arith.cmpi ne, %1, %c0_i32_0 : i32
    scf.if %2 {
      %cst_58 = arith.constant 0.000000e+00 : bf16
      %120 = vector.broadcast %cst_58 : bf16 to vector<8x128xbf16>
      %c0_59 = arith.constant 0 : index
      %c0_60 = arith.constant 0 : index
      %121 = vector.load %arg7[%c0_59, %c0_60] : memref<8x128xbf16, #tpu.memory_space<vmem>>, vector<8x128xbf16>
      tpu.vector_store %arg7[%c0_59, %c0_60], %120 {strides = array<i32>} : memref<8x128xbf16, #tpu.memory_space<vmem>>, vector<8x128xbf16>,
    } else {
    }
    %c0 = arith.constant 0 : index
    %c0_1 = arith.constant 0 : index
    %3 = vector.load %arg3[%c0, %c0_1] : memref<4x128xbf16, #tpu.memory_space<vmem>>, vector<4x128xbf16>
    %c0_2 = arith.constant 0 : index
    %c0_3 = arith.constant 0 : index
    %4 = vector.load %arg4[%c0_2, %c0_3] : memref<128x128xbf16, #tpu.memory_space<vmem>>, vector<128x128xbf16>
    %c0_4 = arith.constant 0 : index
    %c0_5 = arith.constant 0 : index
    %5 = vector.load %arg5[%c0_4, %c0_5] : memref<1x128xf32, #tpu.memory_space<vmem>>, vector<1x128xf32>
    %c0_6 = arith.constant 0 : index
    %c0_7 = arith.constant 0 : index
    %6 = vector.load %arg7[%c0_6, %c0_7] : memref<8x128xbf16, #tpu.memory_space<vmem>>, vector<8x128xbf16>
    %c0_i32_8 = arith.constant 0 : i32
    %7 = arith.index_cast %c0_i32_8 : i32 to index
    %c0_9 = arith.constant 0 : index
    %c0_10 = arith.constant 0 : index
    %8 = vector.load %arg2[%7, %c0_9, %c0_10] : memref<8x8x4xbf16, #tpu.memory_space<vmem>>, vector<1x8x4xbf16>
    %9 = vector.shape_cast %8 : vector<1x8x4xbf16> to vector<8x4xbf16>
    %cst = arith.constant dense<0.000000e+00> : vector<8x128xf32>
    %10 = tpu.matmul %9, %3, %cst {dimension_numbers = #tpu.dot_dimension_numbers<[1], [0], [0], [1], [0, 0, 1, 1], [], []>} : vector<8x4xbf16>, vector<4x128xbf16>, vector<8x128xf32> -> vector<8x128xf32>
    %cst_11 = arith.constant dense<0.000000e+00> : vector<8x128xf32>
    %11 = tpu.matmul %6, %4, %cst_11 {dimension_numbers = #tpu.dot_dimension_numbers<[1], [0], [0], [1], [0, 0, 1, 1], [], []>} : vector<8x128xbf16>, vector<128x128xbf16>, vector<8x128xf32> -> vector<8x128xf32>
    %12 = arith.addf %10, %11 : vector<8x128xf32>
    %13 = vector.broadcast %5 : vector<1x128xf32> to vector<8x128xf32>
    %14 = arith.addf %12, %13 : vector<8x128xf32>
    %15 = math.tanh %14 : vector<8x128xf32>
    %16 = arith.truncf %15 : vector<8x128xf32> to vector<8x128xbf16>
    %17 = arith.index_cast %c0_i32_8 : i32 to index
    %c0_12 = arith.constant 0 : index
    %c0_13 = arith.constant 0 : index
    %18 = vector.load %arg6[%17, %c0_12, %c0_13] : memref<8x8x128xbf16, #tpu.memory_space<vmem>>, vector<1x8x128xbf16>
    %19 = vector.shape_cast %18 : vector<1x8x128xbf16> to vector<8x128xbf16>
    %20 = vector.shape_cast %16 : vector<8x128xbf16> to vector<1x8x128xbf16>
    tpu.vector_store %arg6[%17, %c0_12, %c0_13], %20 {strides = array<i32>} : memref<8x8x128xbf16, #tpu.memory_space<vmem>>, vector<1x8x128xbf16>,
    %c1_i32 = arith.constant 1 : i32
    %21 = arith.index_cast %c1_i32 : i32 to index
    %c0_14 = arith.constant 0 : index
    %c0_15 = arith.constant 0 : index
    %22 = vector.load %arg2[%21, %c0_14, %c0_15] : memref<8x8x4xbf16, #tpu.memory_space<vmem>>, vector<1x8x4xbf16>
    %23 = vector.shape_cast %22 : vector<1x8x4xbf16> to vector<8x4xbf16>
    %cst_16 = arith.constant dense<0.000000e+00> : vector<8x128xf32>
    %24 = tpu.matmul %23, %3, %cst_16 {dimension_numbers = #tpu.dot_dimension_numbers<[1], [0], [0], [1], [0, 0, 1, 1], [], []>} : vector<8x4xbf16>, vector<4x128xbf16>, vector<8x128xf32> -> vector<8x128xf32>
    %cst_17 = arith.constant dense<0.000000e+00> : vector<8x128xf32>
    %25 = tpu.matmul %16, %4, %cst_17 {dimension_numbers = #tpu.dot_dimension_numbers<[1], [0], [0], [1], [0, 0, 1, 1], [], []>} : vector<8x128xbf16>, vector<128x128xbf16>, vector<8x128xf32> -> vector<8x128xf32>
    %26 = arith.addf %24, %25 : vector<8x128xf32>
    %27 = vector.broadcast %5 : vector<1x128xf32> to vector<8x128xf32>
    %28 = arith.addf %26, %27 : vector<8x128xf32>
    %29 = math.tanh %28 : vector<8x128xf32>
    %30 = arith.truncf %29 : vector<8x128xf32> to vector<8x128xbf16>
    %31 = arith.index_cast %c1_i32 : i32 to index
    %c0_18 = arith.constant 0 : index
    %c0_19 = arith.constant 0 : index
    %32 = vector.load %arg6[%31, %c0_18, %c0_19] : memref<8x8x128xbf16, #tpu.memory_space<vmem>>, vector<1x8x128xbf16>
    %33 = vector.shape_cast %32 : vector<1x8x128xbf16> to vector<8x128xbf16>
    %34 = vector.shape_cast %30 : vector<8x128xbf16> to vector<1x8x128xbf16>
    tpu.vector_store %arg6[%31, %c0_18, %c0_19], %34 {strides = array<i32>} : memref<8x8x128xbf16, #tpu.memory_space<vmem>>, vector<1x8x128xbf16>,
    %c2_i32 = arith.constant 2 : i32
    %35 = arith.index_cast %c2_i32 : i32 to index
    %c0_20 = arith.constant 0 : index
    %c0_21 = arith.constant 0 : index
    %36 = vector.load %arg2[%35, %c0_20, %c0_21] : memref<8x8x4xbf16, #tpu.memory_space<vmem>>, vector<1x8x4xbf16>
    %37 = vector.shape_cast %36 : vector<1x8x4xbf16> to vector<8x4xbf16>
    %cst_22 = arith.constant dense<0.000000e+00> : vector<8x128xf32>
    %38 = tpu.matmul %37, %3, %cst_22 {dimension_numbers = #tpu.dot_dimension_numbers<[1], [0], [0], [1], [0, 0, 1, 1], [], []>} : vector<8x4xbf16>, vector<4x128xbf16>, vector<8x128xf32> -> vector<8x128xf32>
    %cst_23 = arith.constant dense<0.000000e+00> : vector<8x128xf32>
    %39 = tpu.matmul %30, %4, %cst_23 {dimension_numbers = #tpu.dot_dimension_numbers<[1], [0], [0], [1], [0, 0, 1, 1], [], []>} : vector<8x128xbf16>, vector<128x128xbf16>, vector<8x128xf32> -> vector<8x128xf32>
    %40 = arith.addf %38, %39 : vector<8x128xf32>
    %41 = vector.broadcast %5 : vector<1x128xf32> to vector<8x128xf32>
    %42 = arith.addf %40, %41 : vector<8x128xf32>
    %43 = math.tanh %42 : vector<8x128xf32>
    %44 = arith.truncf %43 : vector<8x128xf32> to vector<8x128xbf16>
    %45 = arith.index_cast %c2_i32 : i32 to index
    %c0_24 = arith.constant 0 : index
    %c0_25 = arith.constant 0 : index
    %46 = vector.load %arg6[%45, %c0_24, %c0_25] : memref<8x8x128xbf16, #tpu.memory_space<vmem>>, vector<1x8x128xbf16>
    %47 = vector.shape_cast %46 : vector<1x8x128xbf16> to vector<8x128xbf16>
    %48 = vector.shape_cast %44 : vector<8x128xbf16> to vector<1x8x128xbf16>
    tpu.vector_store %arg6[%45, %c0_24, %c0_25], %48 {strides = array<i32>} : memref<8x8x128xbf16, #tpu.memory_space<vmem>>, vector<1x8x128xbf16>,
    %c3_i32 = arith.constant 3 : i32
    %49 = arith.index_cast %c3_i32 : i32 to index
    %c0_26 = arith.constant 0 : index
    %c0_27 = arith.constant 0 : index
    %50 = vector.load %arg2[%49, %c0_26, %c0_27] : memref<8x8x4xbf16, #tpu.memory_space<vmem>>, vector<1x8x4xbf16>
    %51 = vector.shape_cast %50 : vector<1x8x4xbf16> to vector<8x4xbf16>
    %cst_28 = arith.constant dense<0.000000e+00> : vector<8x128xf32>
    %52 = tpu.matmul %51, %3, %cst_28 {dimension_numbers = #tpu.dot_dimension_numbers<[1], [0], [0], [1], [0, 0, 1, 1], [], []>} : vector<8x4xbf16>, vector<4x128xbf16>, vector<8x128xf32> -> vector<8x128xf32>
    %cst_29 = arith.constant dense<0.000000e+00> : vector<8x128xf32>
    %53 = tpu.matmul %44, %4, %cst_29 {dimension_numbers = #tpu.dot_dimension_numbers<[1], [0], [0], [1], [0, 0, 1, 1], [], []>} : vector<8x128xbf16>, vector<128x128xbf16>, vector<8x128xf32> -> vector<8x128xf32>
    %54 = arith.addf %52, %53 : vector<8x128xf32>
    %55 = vector.broadcast %5 : vector<1x128xf32> to vector<8x128xf32>
    %56 = arith.addf %54, %55 : vector<8x128xf32>
    %57 = math.tanh %56 : vector<8x128xf32>
    %58 = arith.truncf %57 : vector<8x128xf32> to vector<8x128xbf16>
    %59 = arith.index_cast %c3_i32 : i32 to index
    %c0_30 = arith.constant 0 : index
    %c0_31 = arith.constant 0 : index
    %60 = vector.load %arg6[%59, %c0_30, %c0_31] : memref<8x8x128xbf16, #tpu.memory_space<vmem>>, vector<1x8x128xbf16>
    %61 = vector.shape_cast %60 : vector<1x8x128xbf16> to vector<8x128xbf16>
    %62 = vector.shape_cast %58 : vector<8x128xbf16> to vector<1x8x128xbf16>
    tpu.vector_store %arg6[%59, %c0_30, %c0_31], %62 {strides = array<i32>} : memref<8x8x128xbf16, #tpu.memory_space<vmem>>, vector<1x8x128xbf16>,
    %c4_i32 = arith.constant 4 : i32
    %63 = arith.index_cast %c4_i32 : i32 to index
    %c0_32 = arith.constant 0 : index
    %c0_33 = arith.constant 0 : index
    %64 = vector.load %arg2[%63, %c0_32, %c0_33] : memref<8x8x4xbf16, #tpu.memory_space<vmem>>, vector<1x8x4xbf16>
    %65 = vector.shape_cast %64 : vector<1x8x4xbf16> to vector<8x4xbf16>
    %cst_34 = arith.constant dense<0.000000e+00> : vector<8x128xf32>
    %66 = tpu.matmul %65, %3, %cst_34 {dimension_numbers = #tpu.dot_dimension_numbers<[1], [0], [0], [1], [0, 0, 1, 1], [], []>} : vector<8x4xbf16>, vector<4x128xbf16>, vector<8x128xf32> -> vector<8x128xf32>
    %cst_35 = arith.constant dense<0.000000e+00> : vector<8x128xf32>
    %67 = tpu.matmul %58, %4, %cst_35 {dimension_numbers = #tpu.dot_dimension_numbers<[1], [0], [0], [1], [0, 0, 1, 1], [], []>} : vector<8x128xbf16>, vector<128x128xbf16>, vector<8x128xf32> -> vector<8x128xf32>
    %68 = arith.addf %66, %67 : vector<8x128xf32>
    %69 = vector.broadcast %5 : vector<1x128xf32> to vector<8x128xf32>
    %70 = arith.addf %68, %69 : vector<8x128xf32>
    %71 = math.tanh %70 : vector<8x128xf32>
    %72 = arith.truncf %71 : vector<8x128xf32> to vector<8x128xbf16>
    %73 = arith.index_cast %c4_i32 : i32 to index
    %c0_36 = arith.constant 0 : index
    %c0_37 = arith.constant 0 : index
    %74 = vector.load %arg6[%73, %c0_36, %c0_37] : memref<8x8x128xbf16, #tpu.memory_space<vmem>>, vector<1x8x128xbf16>
    %75 = vector.shape_cast %74 : vector<1x8x128xbf16> to vector<8x128xbf16>
    %76 = vector.shape_cast %72 : vector<8x128xbf16> to vector<1x8x128xbf16>
    tpu.vector_store %arg6[%73, %c0_36, %c0_37], %76 {strides = array<i32>} : memref<8x8x128xbf16, #tpu.memory_space<vmem>>, vector<1x8x128xbf16>,
    %c5_i32 = arith.constant 5 : i32
    %77 = arith.index_cast %c5_i32 : i32 to index
    %c0_38 = arith.constant 0 : index
    %c0_39 = arith.constant 0 : index
    %78 = vector.load %arg2[%77, %c0_38, %c0_39] : memref<8x8x4xbf16, #tpu.memory_space<vmem>>, vector<1x8x4xbf16>
    %79 = vector.shape_cast %78 : vector<1x8x4xbf16> to vector<8x4xbf16>
    %cst_40 = arith.constant dense<0.000000e+00> : vector<8x128xf32>
    %80 = tpu.matmul %79, %3, %cst_40 {dimension_numbers = #tpu.dot_dimension_numbers<[1], [0], [0], [1], [0, 0, 1, 1], [], []>} : vector<8x4xbf16>, vector<4x128xbf16>, vector<8x128xf32> -> vector<8x128xf32>
    %cst_41 = arith.constant dense<0.000000e+00> : vector<8x128xf32>
    %81 = tpu.matmul %72, %4, %cst_41 {dimension_numbers = #tpu.dot_dimension_numbers<[1], [0], [0], [1], [0, 0, 1, 1], [], []>} : vector<8x128xbf16>, vector<128x128xbf16>, vector<8x128xf32> -> vector<8x128xf32>
    %82 = arith.addf %80, %81 : vector<8x128xf32>
    %83 = vector.broadcast %5 : vector<1x128xf32> to vector<8x128xf32>
    %84 = arith.addf %82, %83 : vector<8x128xf32>
    %85 = math.tanh %84 : vector<8x128xf32>
    %86 = arith.truncf %85 : vector<8x128xf32> to vector<8x128xbf16>
    %87 = arith.index_cast %c5_i32 : i32 to index
    %c0_42 = arith.constant 0 : index
    %c0_43 = arith.constant 0 : index
    %88 = vector.load %arg6[%87, %c0_42, %c0_43] : memref<8x8x128xbf16, #tpu.memory_space<vmem>>, vector<1x8x128xbf16>
    %89 = vector.shape_cast %88 : vector<1x8x128xbf16> to vector<8x128xbf16>
    %90 = vector.shape_cast %86 : vector<8x128xbf16> to vector<1x8x128xbf16>
    tpu.vector_store %arg6[%87, %c0_42, %c0_43], %90 {strides = array<i32>} : memref<8x8x128xbf16, #tpu.memory_space<vmem>>, vector<1x8x128xbf16>,
    %c6_i32 = arith.constant 6 : i32
    %91 = arith.index_cast %c6_i32 : i32 to index
    %c0_44 = arith.constant 0 : index
    %c0_45 = arith.constant 0 : index
    %92 = vector.load %arg2[%91, %c0_44, %c0_45] : memref<8x8x4xbf16, #tpu.memory_space<vmem>>, vector<1x8x4xbf16>
    %93 = vector.shape_cast %92 : vector<1x8x4xbf16> to vector<8x4xbf16>
    %cst_46 = arith.constant dense<0.000000e+00> : vector<8x128xf32>
    %94 = tpu.matmul %93, %3, %cst_46 {dimension_numbers = #tpu.dot_dimension_numbers<[1], [0], [0], [1], [0, 0, 1, 1], [], []>} : vector<8x4xbf16>, vector<4x128xbf16>, vector<8x128xf32> -> vector<8x128xf32>
    %cst_47 = arith.constant dense<0.000000e+00> : vector<8x128xf32>
    %95 = tpu.matmul %86, %4, %cst_47 {dimension_numbers = #tpu.dot_dimension_numbers<[1], [0], [0], [1], [0, 0, 1, 1], [], []>} : vector<8x128xbf16>, vector<128x128xbf16>, vector<8x128xf32> -> vector<8x128xf32>
    %96 = arith.addf %94, %95 : vector<8x128xf32>
    %97 = vector.broadcast %5 : vector<1x128xf32> to vector<8x128xf32>
    %98 = arith.addf %96, %97 : vector<8x128xf32>
    %99 = math.tanh %98 : vector<8x128xf32>
    %100 = arith.truncf %99 : vector<8x128xf32> to vector<8x128xbf16>
    %101 = arith.index_cast %c6_i32 : i32 to index
    %c0_48 = arith.constant 0 : index
    %c0_49 = arith.constant 0 : index
    %102 = vector.load %arg6[%101, %c0_48, %c0_49] : memref<8x8x128xbf16, #tpu.memory_space<vmem>>, vector<1x8x128xbf16>
    %103 = vector.shape_cast %102 : vector<1x8x128xbf16> to vector<8x128xbf16>
    %104 = vector.shape_cast %100 : vector<8x128xbf16> to vector<1x8x128xbf16>
    tpu.vector_store %arg6[%101, %c0_48, %c0_49], %104 {strides = array<i32>} : memref<8x8x128xbf16, #tpu.memory_space<vmem>>, vector<1x8x128xbf16>,
    %c7_i32 = arith.constant 7 : i32
    %105 = arith.index_cast %c7_i32 : i32 to index
    %c0_50 = arith.constant 0 : index
    %c0_51 = arith.constant 0 : index
    %106 = vector.load %arg2[%105, %c0_50, %c0_51] : memref<8x8x4xbf16, #tpu.memory_space<vmem>>, vector<1x8x4xbf16>
    %107 = vector.shape_cast %106 : vector<1x8x4xbf16> to vector<8x4xbf16>
    %cst_52 = arith.constant dense<0.000000e+00> : vector<8x128xf32>
    %108 = tpu.matmul %107, %3, %cst_52 {dimension_numbers = #tpu.dot_dimension_numbers<[1], [0], [0], [1], [0, 0, 1, 1], [], []>} : vector<8x4xbf16>, vector<4x128xbf16>, vector<8x128xf32> -> vector<8x128xf32>
    %cst_53 = arith.constant dense<0.000000e+00> : vector<8x128xf32>
    %109 = tpu.matmul %100, %4, %cst_53 {dimension_numbers = #tpu.dot_dimension_numbers<[1], [0], [0], [1], [0, 0, 1, 1], [], []>} : vector<8x128xbf16>, vector<128x128xbf16>, vector<8x128xf32> -> vector<8x128xf32>
    %110 = arith.addf %108, %109 : vector<8x128xf32>
    %111 = vector.broadcast %5 : vector<1x128xf32> to vector<8x128xf32>
    %112 = arith.addf %110, %111 : vector<8x128xf32>
    %113 = math.tanh %112 : vector<8x128xf32>
    %114 = arith.truncf %113 : vector<8x128xf32> to vector<8x128xbf16>
    %115 = arith.index_cast %c7_i32 : i32 to index
    %c0_54 = arith.constant 0 : index
    %c0_55 = arith.constant 0 : index
    %116 = vector.load %arg6[%115, %c0_54, %c0_55] : memref<8x8x128xbf16, #tpu.memory_space<vmem>>, vector<1x8x128xbf16>
    %117 = vector.shape_cast %116 : vector<1x8x128xbf16> to vector<8x128xbf16>
    %118 = vector.shape_cast %114 : vector<8x128xbf16> to vector<1x8x128xbf16>
    tpu.vector_store %arg6[%115, %c0_54, %c0_55], %118 {strides = array<i32>} : memref<8x8x128xbf16, #tpu.memory_space<vmem>>, vector<1x8x128xbf16>,
    %c8_i32 = arith.constant 8 : i32
    %c0_56 = arith.constant 0 : index
    %c0_57 = arith.constant 0 : index
    %119 = vector.load %arg7[%c0_56, %c0_57] : memref<8x128xbf16, #tpu.memory_space<vmem>>, vector<8x128xbf16>
    tpu.vector_store %arg7[%c0_56, %c0_57], %114 {strides = array<i32>} : memref<8x128xbf16, #tpu.memory_space<vmem>>, vector<8x128xbf16>,
    return
  }
  func.func @transform_0(%arg0: i32, %arg1: i32) -> (i32, i32, i32) {
    %c0_i32 = arith.constant 0 : i32
    %c0_i32_0 = arith.constant 0 : i32
    return %arg1, %arg0, %c0_i32 : i32, i32, i32
  }
  func.func @transform_1(%arg0: i32, %arg1: i32) -> (i32, i32) {
    %c0_i32 = arith.constant 0 : i32
    %c0_i32_0 = arith.constant 0 : i32
    %c0_i32_1 = arith.constant 0 : i32
    return %c0_i32, %c0_i32_0 : i32, i32
  }
  func.func @transform_2(%arg0: i32, %arg1: i32) -> (i32, i32) {
    %c0_i32 = arith.constant 0 : i32
    %c0_i32_0 = arith.constant 0 : i32
    %c0_i32_1 = arith.constant 0 : i32
    return %c0_i32, %c0_i32_0 : i32, i32
  }
  func.func @transform_3(%arg0: i32, %arg1: i32) -> (i32, i32) {
    %c0_i32 = arith.constant 0 : i32
    %c0_i32_0 = arith.constant 0 : i32
    %c0_i32_1 = arith.constant 0 : i32
    return %c0_i32, %c0_i32_0 : i32, i32
  }
  func.func @transform_4(%arg0: i32, %arg1: i32) -> (i32, i32, i32) {
    %c0_i32 = arith.constant 0 : i32
    %c0_i32_0 = arith.constant 0 : i32
    return %arg1, %arg0, %c0_i32 : i32, i32, i32
  }
}

module attributes {stable_mosaic.version = 11 : i64} {
  func.func @_matmul_bias_kernel(%arg0: i32, %arg1: memref<64x128xbf16, #tpu.memory_space<vmem>>, %arg2: memref<128x128xbf16, #tpu.memory_space<vmem>>, %arg3: memref<1x128xf32, #tpu.memory_space<vmem>>, %arg4: memref<64x128xf32, #tpu.memory_space<vmem>>) attributes {dimension_semantics = [#tpu.dimension_semantics<parallel>], iteration_bounds = array<i64: 1>, scalar_prefetch = 0 : i64, scratch_operands = 0 : i64, tpu.core_type = #tpu.core_type<tc>, window_params = [{transform_indices = @transform_0, window_bounds = array<i64: 64, 128>}, {pipeline_mode = #tpu.pipeline_mode<synchronous>, transform_indices = @transform_1, window_bounds = array<i64: 128, 128>}, {pipeline_mode = #tpu.pipeline_mode<synchronous>, transform_indices = @transform_2, window_bounds = array<i64: 1, 128>}, {transform_indices = @transform_3, window_bounds = array<i64: 64, 128>}]} {
    %c0 = arith.constant 0 : index
    %c0_0 = arith.constant 0 : index
    %0 = vector.load %arg1[%c0, %c0_0] : memref<64x128xbf16, #tpu.memory_space<vmem>>, vector<64x128xbf16>
    %c0_1 = arith.constant 0 : index
    %c0_2 = arith.constant 0 : index
    %1 = vector.load %arg2[%c0_1, %c0_2] : memref<128x128xbf16, #tpu.memory_space<vmem>>, vector<128x128xbf16>
    %cst = arith.constant dense<0.000000e+00> : vector<64x128xf32>
    %2 = tpu.matmul %0, %1, %cst {dimension_numbers = #tpu.dot_dimension_numbers<[1], [0], [0], [1], [0, 0, 1, 1], [], []>} : vector<64x128xbf16>, vector<128x128xbf16>, vector<64x128xf32> -> vector<64x128xf32>
    %c0_3 = arith.constant 0 : index
    %c0_4 = arith.constant 0 : index
    %3 = vector.load %arg3[%c0_3, %c0_4] : memref<1x128xf32, #tpu.memory_space<vmem>>, vector<1x128xf32>
    %4 = vector.broadcast %3 : vector<1x128xf32> to vector<64x128xf32>
    %5 = arith.addf %2, %4 : vector<64x128xf32>
    %c0_5 = arith.constant 0 : index
    %c0_6 = arith.constant 0 : index
    %6 = vector.load %arg4[%c0_5, %c0_6] : memref<64x128xf32, #tpu.memory_space<vmem>>, vector<64x128xf32>
    tpu.vector_store %arg4[%c0_5, %c0_6], %5 {strides = array<i32>} : memref<64x128xf32, #tpu.memory_space<vmem>>, vector<64x128xf32>,
    return
  }
  func.func @transform_0(%arg0: i32) -> (i32, i32) {
    %c0_i32 = arith.constant 0 : i32
    %c0_i32_0 = arith.constant 0 : i32
    return %arg0, %c0_i32 : i32, i32
  }
  func.func @transform_1(%arg0: i32) -> (i32, i32) {
    %c0_i32 = arith.constant 0 : i32
    %c0_i32_0 = arith.constant 0 : i32
    %c0_i32_1 = arith.constant 0 : i32
    return %c0_i32, %c0_i32_0 : i32, i32
  }
  func.func @transform_2(%arg0: i32) -> (i32, i32) {
    %c0_i32 = arith.constant 0 : i32
    %c0_i32_0 = arith.constant 0 : i32
    %c0_i32_1 = arith.constant 0 : i32
    return %c0_i32, %c0_i32_0 : i32, i32
  }
  func.func @transform_3(%arg0: i32) -> (i32, i32) {
    %c0_i32 = arith.constant 0 : i32
    %c0_i32_0 = arith.constant 0 : i32
    return %arg0, %c0_i32 : i32, i32
  }
}

module attributes {stable_mosaic.version = 11 : i64} {
  func.func @_rnn_layer_kernel(%arg0: i32, %arg1: i32, %arg2: memref<8x8x128xbf16, #tpu.memory_space<vmem>>, %arg3: memref<128x128xbf16, #tpu.memory_space<vmem>>, %arg4: memref<128x128xbf16, #tpu.memory_space<vmem>>, %arg5: memref<1x128xf32, #tpu.memory_space<vmem>>, %arg6: memref<8x8x128xbf16, #tpu.memory_space<vmem>>, %arg7: memref<8x128xbf16, #tpu.memory_space<vmem>>) attributes {dimension_semantics = [#tpu.dimension_semantics<parallel>, #tpu.dimension_semantics<arbitrary>], iteration_bounds = array<i64: 1, 1>, scalar_prefetch = 0 : i64, scratch_operands = 1 : i64, tpu.core_type = #tpu.core_type<tc>, window_params = [{transform_indices = @transform_0, window_bounds = array<i64: 8, 8, 128>}, {pipeline_mode = #tpu.pipeline_mode<synchronous>, transform_indices = @transform_1, window_bounds = array<i64: 128, 128>}, {pipeline_mode = #tpu.pipeline_mode<synchronous>, transform_indices = @transform_2, window_bounds = array<i64: 128, 128>}, {pipeline_mode = #tpu.pipeline_mode<synchronous>, transform_indices = @transform_3, window_bounds = array<i64: 1, 128>}, {transform_indices = @transform_4, window_bounds = array<i64: 8, 8, 128>}]} {
    %c0_i32 = arith.constant 0 : i32
    %0 = arith.cmpi eq, %arg1, %c0_i32 : i32
    %1 = arith.extui %0 : i1 to i32
    %c0_i32_0 = arith.constant 0 : i32
    %2 = arith.cmpi ne, %1, %c0_i32_0 : i32
    scf.if %2 {
      %cst_58 = arith.constant 0.000000e+00 : bf16
      %120 = vector.broadcast %cst_58 : bf16 to vector<8x128xbf16>
      %c0_59 = arith.constant 0 : index
      %c0_60 = arith.constant 0 : index
      %121 = vector.load %arg7[%c0_59, %c0_60] : memref<8x128xbf16, #tpu.memory_space<vmem>>, vector<8x128xbf16>
      tpu.vector_store %arg7[%c0_59, %c0_60], %120 {strides = array<i32>} : memref<8x128xbf16, #tpu.memory_space<vmem>>, vector<8x128xbf16>,
    } else {
    }
    %c0 = arith.constant 0 : index
    %c0_1 = arith.constant 0 : index
    %3 = vector.load %arg3[%c0, %c0_1] : memref<128x128xbf16, #tpu.memory_space<vmem>>, vector<128x128xbf16>
    %c0_2 = arith.constant 0 : index
    %c0_3 = arith.constant 0 : index
    %4 = vector.load %arg4[%c0_2, %c0_3] : memref<128x128xbf16, #tpu.memory_space<vmem>>, vector<128x128xbf16>
    %c0_4 = arith.constant 0 : index
    %c0_5 = arith.constant 0 : index
    %5 = vector.load %arg5[%c0_4, %c0_5] : memref<1x128xf32, #tpu.memory_space<vmem>>, vector<1x128xf32>
    %c0_6 = arith.constant 0 : index
    %c0_7 = arith.constant 0 : index
    %6 = vector.load %arg7[%c0_6, %c0_7] : memref<8x128xbf16, #tpu.memory_space<vmem>>, vector<8x128xbf16>
    %c0_i32_8 = arith.constant 0 : i32
    %7 = arith.index_cast %c0_i32_8 : i32 to index
    %c0_9 = arith.constant 0 : index
    %c0_10 = arith.constant 0 : index
    %8 = vector.load %arg2[%7, %c0_9, %c0_10] : memref<8x8x128xbf16, #tpu.memory_space<vmem>>, vector<1x8x128xbf16>
    %9 = vector.shape_cast %8 : vector<1x8x128xbf16> to vector<8x128xbf16>
    %cst = arith.constant dense<0.000000e+00> : vector<8x128xf32>
    %10 = tpu.matmul %9, %3, %cst {dimension_numbers = #tpu.dot_dimension_numbers<[1], [0], [0], [1], [0, 0, 1, 1], [], []>} : vector<8x128xbf16>, vector<128x128xbf16>, vector<8x128xf32> -> vector<8x128xf32>
    %cst_11 = arith.constant dense<0.000000e+00> : vector<8x128xf32>
    %11 = tpu.matmul %6, %4, %cst_11 {dimension_numbers = #tpu.dot_dimension_numbers<[1], [0], [0], [1], [0, 0, 1, 1], [], []>} : vector<8x128xbf16>, vector<128x128xbf16>, vector<8x128xf32> -> vector<8x128xf32>
    %12 = arith.addf %10, %11 : vector<8x128xf32>
    %13 = vector.broadcast %5 : vector<1x128xf32> to vector<8x128xf32>
    %14 = arith.addf %12, %13 : vector<8x128xf32>
    %15 = math.tanh %14 : vector<8x128xf32>
    %16 = arith.truncf %15 : vector<8x128xf32> to vector<8x128xbf16>
    %17 = arith.index_cast %c0_i32_8 : i32 to index
    %c0_12 = arith.constant 0 : index
    %c0_13 = arith.constant 0 : index
    %18 = vector.load %arg6[%17, %c0_12, %c0_13] : memref<8x8x128xbf16, #tpu.memory_space<vmem>>, vector<1x8x128xbf16>
    %19 = vector.shape_cast %18 : vector<1x8x128xbf16> to vector<8x128xbf16>
    %20 = vector.shape_cast %16 : vector<8x128xbf16> to vector<1x8x128xbf16>
    tpu.vector_store %arg6[%17, %c0_12, %c0_13], %20 {strides = array<i32>} : memref<8x8x128xbf16, #tpu.memory_space<vmem>>, vector<1x8x128xbf16>,
    %c1_i32 = arith.constant 1 : i32
    %21 = arith.index_cast %c1_i32 : i32 to index
    %c0_14 = arith.constant 0 : index
    %c0_15 = arith.constant 0 : index
    %22 = vector.load %arg2[%21, %c0_14, %c0_15] : memref<8x8x128xbf16, #tpu.memory_space<vmem>>, vector<1x8x128xbf16>
    %23 = vector.shape_cast %22 : vector<1x8x128xbf16> to vector<8x128xbf16>
    %cst_16 = arith.constant dense<0.000000e+00> : vector<8x128xf32>
    %24 = tpu.matmul %23, %3, %cst_16 {dimension_numbers = #tpu.dot_dimension_numbers<[1], [0], [0], [1], [0, 0, 1, 1], [], []>} : vector<8x128xbf16>, vector<128x128xbf16>, vector<8x128xf32> -> vector<8x128xf32>
    %cst_17 = arith.constant dense<0.000000e+00> : vector<8x128xf32>
    %25 = tpu.matmul %16, %4, %cst_17 {dimension_numbers = #tpu.dot_dimension_numbers<[1], [0], [0], [1], [0, 0, 1, 1], [], []>} : vector<8x128xbf16>, vector<128x128xbf16>, vector<8x128xf32> -> vector<8x128xf32>
    %26 = arith.addf %24, %25 : vector<8x128xf32>
    %27 = vector.broadcast %5 : vector<1x128xf32> to vector<8x128xf32>
    %28 = arith.addf %26, %27 : vector<8x128xf32>
    %29 = math.tanh %28 : vector<8x128xf32>
    %30 = arith.truncf %29 : vector<8x128xf32> to vector<8x128xbf16>
    %31 = arith.index_cast %c1_i32 : i32 to index
    %c0_18 = arith.constant 0 : index
    %c0_19 = arith.constant 0 : index
    %32 = vector.load %arg6[%31, %c0_18, %c0_19] : memref<8x8x128xbf16, #tpu.memory_space<vmem>>, vector<1x8x128xbf16>
    %33 = vector.shape_cast %32 : vector<1x8x128xbf16> to vector<8x128xbf16>
    %34 = vector.shape_cast %30 : vector<8x128xbf16> to vector<1x8x128xbf16>
    tpu.vector_store %arg6[%31, %c0_18, %c0_19], %34 {strides = array<i32>} : memref<8x8x128xbf16, #tpu.memory_space<vmem>>, vector<1x8x128xbf16>,
    %c2_i32 = arith.constant 2 : i32
    %35 = arith.index_cast %c2_i32 : i32 to index
    %c0_20 = arith.constant 0 : index
    %c0_21 = arith.constant 0 : index
    %36 = vector.load %arg2[%35, %c0_20, %c0_21] : memref<8x8x128xbf16, #tpu.memory_space<vmem>>, vector<1x8x128xbf16>
    %37 = vector.shape_cast %36 : vector<1x8x128xbf16> to vector<8x128xbf16>
    %cst_22 = arith.constant dense<0.000000e+00> : vector<8x128xf32>
    %38 = tpu.matmul %37, %3, %cst_22 {dimension_numbers = #tpu.dot_dimension_numbers<[1], [0], [0], [1], [0, 0, 1, 1], [], []>} : vector<8x128xbf16>, vector<128x128xbf16>, vector<8x128xf32> -> vector<8x128xf32>
    %cst_23 = arith.constant dense<0.000000e+00> : vector<8x128xf32>
    %39 = tpu.matmul %30, %4, %cst_23 {dimension_numbers = #tpu.dot_dimension_numbers<[1], [0], [0], [1], [0, 0, 1, 1], [], []>} : vector<8x128xbf16>, vector<128x128xbf16>, vector<8x128xf32> -> vector<8x128xf32>
    %40 = arith.addf %38, %39 : vector<8x128xf32>
    %41 = vector.broadcast %5 : vector<1x128xf32> to vector<8x128xf32>
    %42 = arith.addf %40, %41 : vector<8x128xf32>
    %43 = math.tanh %42 : vector<8x128xf32>
    %44 = arith.truncf %43 : vector<8x128xf32> to vector<8x128xbf16>
    %45 = arith.index_cast %c2_i32 : i32 to index
    %c0_24 = arith.constant 0 : index
    %c0_25 = arith.constant 0 : index
    %46 = vector.load %arg6[%45, %c0_24, %c0_25] : memref<8x8x128xbf16, #tpu.memory_space<vmem>>, vector<1x8x128xbf16>
    %47 = vector.shape_cast %46 : vector<1x8x128xbf16> to vector<8x128xbf16>
    %48 = vector.shape_cast %44 : vector<8x128xbf16> to vector<1x8x128xbf16>
    tpu.vector_store %arg6[%45, %c0_24, %c0_25], %48 {strides = array<i32>} : memref<8x8x128xbf16, #tpu.memory_space<vmem>>, vector<1x8x128xbf16>,
    %c3_i32 = arith.constant 3 : i32
    %49 = arith.index_cast %c3_i32 : i32 to index
    %c0_26 = arith.constant 0 : index
    %c0_27 = arith.constant 0 : index
    %50 = vector.load %arg2[%49, %c0_26, %c0_27] : memref<8x8x128xbf16, #tpu.memory_space<vmem>>, vector<1x8x128xbf16>
    %51 = vector.shape_cast %50 : vector<1x8x128xbf16> to vector<8x128xbf16>
    %cst_28 = arith.constant dense<0.000000e+00> : vector<8x128xf32>
    %52 = tpu.matmul %51, %3, %cst_28 {dimension_numbers = #tpu.dot_dimension_numbers<[1], [0], [0], [1], [0, 0, 1, 1], [], []>} : vector<8x128xbf16>, vector<128x128xbf16>, vector<8x128xf32> -> vector<8x128xf32>
    %cst_29 = arith.constant dense<0.000000e+00> : vector<8x128xf32>
    %53 = tpu.matmul %44, %4, %cst_29 {dimension_numbers = #tpu.dot_dimension_numbers<[1], [0], [0], [1], [0, 0, 1, 1], [], []>} : vector<8x128xbf16>, vector<128x128xbf16>, vector<8x128xf32> -> vector<8x128xf32>
    %54 = arith.addf %52, %53 : vector<8x128xf32>
    %55 = vector.broadcast %5 : vector<1x128xf32> to vector<8x128xf32>
    %56 = arith.addf %54, %55 : vector<8x128xf32>
    %57 = math.tanh %56 : vector<8x128xf32>
    %58 = arith.truncf %57 : vector<8x128xf32> to vector<8x128xbf16>
    %59 = arith.index_cast %c3_i32 : i32 to index
    %c0_30 = arith.constant 0 : index
    %c0_31 = arith.constant 0 : index
    %60 = vector.load %arg6[%59, %c0_30, %c0_31] : memref<8x8x128xbf16, #tpu.memory_space<vmem>>, vector<1x8x128xbf16>
    %61 = vector.shape_cast %60 : vector<1x8x128xbf16> to vector<8x128xbf16>
    %62 = vector.shape_cast %58 : vector<8x128xbf16> to vector<1x8x128xbf16>
    tpu.vector_store %arg6[%59, %c0_30, %c0_31], %62 {strides = array<i32>} : memref<8x8x128xbf16, #tpu.memory_space<vmem>>, vector<1x8x128xbf16>,
    %c4_i32 = arith.constant 4 : i32
    %63 = arith.index_cast %c4_i32 : i32 to index
    %c0_32 = arith.constant 0 : index
    %c0_33 = arith.constant 0 : index
    %64 = vector.load %arg2[%63, %c0_32, %c0_33] : memref<8x8x128xbf16, #tpu.memory_space<vmem>>, vector<1x8x128xbf16>
    %65 = vector.shape_cast %64 : vector<1x8x128xbf16> to vector<8x128xbf16>
    %cst_34 = arith.constant dense<0.000000e+00> : vector<8x128xf32>
    %66 = tpu.matmul %65, %3, %cst_34 {dimension_numbers = #tpu.dot_dimension_numbers<[1], [0], [0], [1], [0, 0, 1, 1], [], []>} : vector<8x128xbf16>, vector<128x128xbf16>, vector<8x128xf32> -> vector<8x128xf32>
    %cst_35 = arith.constant dense<0.000000e+00> : vector<8x128xf32>
    %67 = tpu.matmul %58, %4, %cst_35 {dimension_numbers = #tpu.dot_dimension_numbers<[1], [0], [0], [1], [0, 0, 1, 1], [], []>} : vector<8x128xbf16>, vector<128x128xbf16>, vector<8x128xf32> -> vector<8x128xf32>
    %68 = arith.addf %66, %67 : vector<8x128xf32>
    %69 = vector.broadcast %5 : vector<1x128xf32> to vector<8x128xf32>
    %70 = arith.addf %68, %69 : vector<8x128xf32>
    %71 = math.tanh %70 : vector<8x128xf32>
    %72 = arith.truncf %71 : vector<8x128xf32> to vector<8x128xbf16>
    %73 = arith.index_cast %c4_i32 : i32 to index
    %c0_36 = arith.constant 0 : index
    %c0_37 = arith.constant 0 : index
    %74 = vector.load %arg6[%73, %c0_36, %c0_37] : memref<8x8x128xbf16, #tpu.memory_space<vmem>>, vector<1x8x128xbf16>
    %75 = vector.shape_cast %74 : vector<1x8x128xbf16> to vector<8x128xbf16>
    %76 = vector.shape_cast %72 : vector<8x128xbf16> to vector<1x8x128xbf16>
    tpu.vector_store %arg6[%73, %c0_36, %c0_37], %76 {strides = array<i32>} : memref<8x8x128xbf16, #tpu.memory_space<vmem>>, vector<1x8x128xbf16>,
    %c5_i32 = arith.constant 5 : i32
    %77 = arith.index_cast %c5_i32 : i32 to index
    %c0_38 = arith.constant 0 : index
    %c0_39 = arith.constant 0 : index
    %78 = vector.load %arg2[%77, %c0_38, %c0_39] : memref<8x8x128xbf16, #tpu.memory_space<vmem>>, vector<1x8x128xbf16>
    %79 = vector.shape_cast %78 : vector<1x8x128xbf16> to vector<8x128xbf16>
    %cst_40 = arith.constant dense<0.000000e+00> : vector<8x128xf32>
    %80 = tpu.matmul %79, %3, %cst_40 {dimension_numbers = #tpu.dot_dimension_numbers<[1], [0], [0], [1], [0, 0, 1, 1], [], []>} : vector<8x128xbf16>, vector<128x128xbf16>, vector<8x128xf32> -> vector<8x128xf32>
    %cst_41 = arith.constant dense<0.000000e+00> : vector<8x128xf32>
    %81 = tpu.matmul %72, %4, %cst_41 {dimension_numbers = #tpu.dot_dimension_numbers<[1], [0], [0], [1], [0, 0, 1, 1], [], []>} : vector<8x128xbf16>, vector<128x128xbf16>, vector<8x128xf32> -> vector<8x128xf32>
    %82 = arith.addf %80, %81 : vector<8x128xf32>
    %83 = vector.broadcast %5 : vector<1x128xf32> to vector<8x128xf32>
    %84 = arith.addf %82, %83 : vector<8x128xf32>
    %85 = math.tanh %84 : vector<8x128xf32>
    %86 = arith.truncf %85 : vector<8x128xf32> to vector<8x128xbf16>
    %87 = arith.index_cast %c5_i32 : i32 to index
    %c0_42 = arith.constant 0 : index
    %c0_43 = arith.constant 0 : index
    %88 = vector.load %arg6[%87, %c0_42, %c0_43] : memref<8x8x128xbf16, #tpu.memory_space<vmem>>, vector<1x8x128xbf16>
    %89 = vector.shape_cast %88 : vector<1x8x128xbf16> to vector<8x128xbf16>
    %90 = vector.shape_cast %86 : vector<8x128xbf16> to vector<1x8x128xbf16>
    tpu.vector_store %arg6[%87, %c0_42, %c0_43], %90 {strides = array<i32>} : memref<8x8x128xbf16, #tpu.memory_space<vmem>>, vector<1x8x128xbf16>,
    %c6_i32 = arith.constant 6 : i32
    %91 = arith.index_cast %c6_i32 : i32 to index
    %c0_44 = arith.constant 0 : index
    %c0_45 = arith.constant 0 : index
    %92 = vector.load %arg2[%91, %c0_44, %c0_45] : memref<8x8x128xbf16, #tpu.memory_space<vmem>>, vector<1x8x128xbf16>
    %93 = vector.shape_cast %92 : vector<1x8x128xbf16> to vector<8x128xbf16>
    %cst_46 = arith.constant dense<0.000000e+00> : vector<8x128xf32>
    %94 = tpu.matmul %93, %3, %cst_46 {dimension_numbers = #tpu.dot_dimension_numbers<[1], [0], [0], [1], [0, 0, 1, 1], [], []>} : vector<8x128xbf16>, vector<128x128xbf16>, vector<8x128xf32> -> vector<8x128xf32>
    %cst_47 = arith.constant dense<0.000000e+00> : vector<8x128xf32>
    %95 = tpu.matmul %86, %4, %cst_47 {dimension_numbers = #tpu.dot_dimension_numbers<[1], [0], [0], [1], [0, 0, 1, 1], [], []>} : vector<8x128xbf16>, vector<128x128xbf16>, vector<8x128xf32> -> vector<8x128xf32>
    %96 = arith.addf %94, %95 : vector<8x128xf32>
    %97 = vector.broadcast %5 : vector<1x128xf32> to vector<8x128xf32>
    %98 = arith.addf %96, %97 : vector<8x128xf32>
    %99 = math.tanh %98 : vector<8x128xf32>
    %100 = arith.truncf %99 : vector<8x128xf32> to vector<8x128xbf16>
    %101 = arith.index_cast %c6_i32 : i32 to index
    %c0_48 = arith.constant 0 : index
    %c0_49 = arith.constant 0 : index
    %102 = vector.load %arg6[%101, %c0_48, %c0_49] : memref<8x8x128xbf16, #tpu.memory_space<vmem>>, vector<1x8x128xbf16>
    %103 = vector.shape_cast %102 : vector<1x8x128xbf16> to vector<8x128xbf16>
    %104 = vector.shape_cast %100 : vector<8x128xbf16> to vector<1x8x128xbf16>
    tpu.vector_store %arg6[%101, %c0_48, %c0_49], %104 {strides = array<i32>} : memref<8x8x128xbf16, #tpu.memory_space<vmem>>, vector<1x8x128xbf16>,
    %c7_i32 = arith.constant 7 : i32
    %105 = arith.index_cast %c7_i32 : i32 to index
    %c0_50 = arith.constant 0 : index
    %c0_51 = arith.constant 0 : index
    %106 = vector.load %arg2[%105, %c0_50, %c0_51] : memref<8x8x128xbf16, #tpu.memory_space<vmem>>, vector<1x8x128xbf16>
    %107 = vector.shape_cast %106 : vector<1x8x128xbf16> to vector<8x128xbf16>
    %cst_52 = arith.constant dense<0.000000e+00> : vector<8x128xf32>
    %108 = tpu.matmul %107, %3, %cst_52 {dimension_numbers = #tpu.dot_dimension_numbers<[1], [0], [0], [1], [0, 0, 1, 1], [], []>} : vector<8x128xbf16>, vector<128x128xbf16>, vector<8x128xf32> -> vector<8x128xf32>
    %cst_53 = arith.constant dense<0.000000e+00> : vector<8x128xf32>
    %109 = tpu.matmul %100, %4, %cst_53 {dimension_numbers = #tpu.dot_dimension_numbers<[1], [0], [0], [1], [0, 0, 1, 1], [], []>} : vector<8x128xbf16>, vector<128x128xbf16>, vector<8x128xf32> -> vector<8x128xf32>
    %110 = arith.addf %108, %109 : vector<8x128xf32>
    %111 = vector.broadcast %5 : vector<1x128xf32> to vector<8x128xf32>
    %112 = arith.addf %110, %111 : vector<8x128xf32>
    %113 = math.tanh %112 : vector<8x128xf32>
    %114 = arith.truncf %113 : vector<8x128xf32> to vector<8x128xbf16>
    %115 = arith.index_cast %c7_i32 : i32 to index
    %c0_54 = arith.constant 0 : index
    %c0_55 = arith.constant 0 : index
    %116 = vector.load %arg6[%115, %c0_54, %c0_55] : memref<8x8x128xbf16, #tpu.memory_space<vmem>>, vector<1x8x128xbf16>
    %117 = vector.shape_cast %116 : vector<1x8x128xbf16> to vector<8x128xbf16>
    %118 = vector.shape_cast %114 : vector<8x128xbf16> to vector<1x8x128xbf16>
    tpu.vector_store %arg6[%115, %c0_54, %c0_55], %118 {strides = array<i32>} : memref<8x8x128xbf16, #tpu.memory_space<vmem>>, vector<1x8x128xbf16>,
    %c8_i32 = arith.constant 8 : i32
    %c0_56 = arith.constant 0 : index
    %c0_57 = arith.constant 0 : index
    %119 = vector.load %arg7[%c0_56, %c0_57] : memref<8x128xbf16, #tpu.memory_space<vmem>>, vector<8x128xbf16>
    tpu.vector_store %arg7[%c0_56, %c0_57], %114 {strides = array<i32>} : memref<8x128xbf16, #tpu.memory_space<vmem>>, vector<8x128xbf16>,
    return
  }
  func.func @transform_0(%arg0: i32, %arg1: i32) -> (i32, i32, i32) {
    %c0_i32 = arith.constant 0 : i32
    %c0_i32_0 = arith.constant 0 : i32
    return %arg1, %arg0, %c0_i32 : i32, i32, i32
  }
  func.func @transform_1(%arg0: i32, %arg1: i32) -> (i32, i32) {
    %c0_i32 = arith.constant 0 : i32
    %c0_i32_0 = arith.constant 0 : i32
    %c0_i32_1 = arith.constant 0 : i32
    return %c0_i32, %c0_i32_0 : i32, i32
  }
  func.func @transform_2(%arg0: i32, %arg1: i32) -> (i32, i32) {
    %c0_i32 = arith.constant 0 : i32
    %c0_i32_0 = arith.constant 0 : i32
    %c0_i32_1 = arith.constant 0 : i32
    return %c0_i32, %c0_i32_0 : i32, i32
  }
  func.func @transform_3(%arg0: i32, %arg1: i32) -> (i32, i32) {
    %c0_i32 = arith.constant 0 : i32
    %c0_i32_0 = arith.constant 0 : i32
    %c0_i32_1 = arith.constant 0 : i32
    return %c0_i32, %c0_i32_0 : i32, i32
  }
  func.func @transform_4(%arg0: i32, %arg1: i32) -> (i32, i32, i32) {
    %c0_i32 = arith.constant 0 : i32
    %c0_i32_0 = arith.constant 0 : i32
    return %arg1, %arg0, %c0_i32 : i32, i32, i32
  }
}

</mosaic_0001>

<bundles_post_ra>
// kernel: rnn_model_forward.5
= control target key start
LH: loop header
LB: loop body
LE: loop exit
PB: predicated region body
PF: predicated region fallthrough
CT: control target
= control target key end

     0   :  { %s355_s1 = inlined_call_operand.vmem [shape: bf16[128,128], index: 1, kind: input, shape index: {}]   ;;  %s356_s0 = inlined_call_operand.vmem [shape: bf16[64,128], index: 0, kind: input, shape index: {}]   ;;  %s357_s2 = inlined_call_operand.vmem [shape: f32[1,128], index: 2, kind: input, shape index: {}]   ;;  %s358_s3 = inlined_call_operand.vmem [shape: f32[64,128], index: 3, kind: output, shape index: {}]  }
   0x1   :  { %v260_v0 = vld [vmem:[%s355_s1] sm:$0xff]   ;;  %v261_v1 = vld [vmem:[%s355_s1 + $0x8] sm:$0xff]   ;;  %v262_v2 = vld [vmem:[%s355_s1 + $0x10] sm:$0xff]  }
   0x2   :  { %220 = vmatprep.subr.bf16.mxu0 %v260_v0  ;;  %244 = vmatprep.subr.bf16.mxu1 %v260_v0  ;;  %v263_v3 = vld [vmem:[%s355_s1 + $0x18] sm:$0xff]   ;;  %v268_v4 = vld [vmem:[%s356_s0] sm:$0xff]   ;;  %v269_v5 = vld [vmem:[%s356_s0 + $0x10] sm:$0xff]  }
   0x3   :  { %221 = vmatpush3.bf16.msra.mxu0 %v260_v0  ;;  %252 = vmatpush3.bf16.msra.mxu1 %v260_v0  ;;  %v264_v6 = vld [vmem:[%s355_s1 + $0x20] sm:$0xff]   ;;  %v265_v7 = vld [vmem:[%s355_s1 + $0x28] sm:$0xff]   ;;  %v266_v8 = vld [vmem:[%s355_s1 + $0x30] sm:$0xff]  }
   0x4   :  { %222 = vmatprep.subr.bf16.mxu0 %v261_v1  ;;  %245 = vmatprep.subr.bf16.mxu1 %v261_v1  ;;  %v267_v9 = vld [vmem:[%s355_s1 + $0x38] sm:$0xff]   ;;  %v270_v10 = vld [vmem:[%s356_s0 + $0x8] sm:$0xff]   ;;  %v195_v12 = vld [vmem:[%s357_s2] ss:$0 sm:$0xff] }
   0x5   :  { %236 = vmatprep.mubr.bf16.mxu0 %v268_v4  ;;  %240 = vmatprep.mubr.bf16.mxu1 %v269_v5  ;;  %v271_v11 = vld [vmem:[%s356_s0 + $0x18] sm:$0xff]  }
   0x7   :  { %223 = vmatpush3.bf16.msra.mxu0 %v261_v1  ;;  %253 = vmatpush3.bf16.msra.mxu1 %v261_v1 }
   0x8   :  { %224 = vmatprep.subr.bf16.mxu0 %v262_v2  ;;  %246 = vmatprep.subr.bf16.mxu1 %v262_v2 }
   0xb   :  { %225 = vmatpush3.bf16.msra.mxu0 %v262_v2  ;;  %254 = vmatpush3.bf16.msra.mxu1 %v262_v2 }
   0xc   :  { %226 = vmatprep.subr.bf16.mxu0 %v263_v3  ;;  %247 = vmatprep.subr.bf16.mxu1 %v263_v3 }
   0xf   :  { %227 = vmatpush3.bf16.msra.mxu0 %v263_v3  ;;  %255 = vmatpush3.bf16.msra.mxu1 %v263_v3 }
  0x10   :  { %228 = vmatprep.subr.bf16.mxu0 %v264_v6  ;;  %248 = vmatprep.subr.bf16.mxu1 %v264_v6 }
  0x13   :  { %229 = vmatpush3.bf16.msra.mxu0 %v264_v6  ;;  %256 = vmatpush3.bf16.msra.mxu1 %v264_v6 }
  0x14   :  { %230 = vmatprep.subr.bf16.mxu0 %v265_v7  ;;  %249 = vmatprep.subr.bf16.mxu1 %v265_v7 }
  0x17   :  { %231 = vmatpush3.bf16.msra.mxu0 %v265_v7  ;;  %257 = vmatpush3.bf16.msra.mxu1 %v265_v7 }
  0x18   :  { %232 = vmatprep.subr.bf16.mxu0 %v266_v8  ;;  %250 = vmatprep.subr.bf16.mxu1 %v266_v8 }
  0x1b   :  { %233 = vmatpush3.bf16.msra.mxu0 %v266_v8  ;;  %258 = vmatpush3.bf16.msra.mxu1 %v266_v8 }
  0x1c   :  { %234 = vmatprep.subr.bf16.mxu0 %v267_v9  ;;  %251 = vmatprep.subr.bf16.mxu1 %v267_v9 }
  0x1f   :  { %235 = vmatpush3.bf16.msra.mxu0 %v267_v9  ;;  %259 = vmatpush3.bf16.msra.mxu1 %v267_v9 }
  0x22   :  { %237 = vmatmul.mubr.bf16.vlgmr.msra.gmra.mrb[0].mxu0 %v270_v10  ;;  %241 = vmatmul.mubr.bf16.vlgmr.msra.gmra.mrb[0].mxu1 %v271_v11 }
  0xf5   :  { %v238_v13 = vpop.f32.mrb[0].mxu0  ;;  %v242_v14 = vpop.f32.mrb[0].mxu1 }
  0xf6   :  { %v161_v15 = vadd.f32 %v238_v13, %v195_v12  ;;  %v177_v16 = vadd.f32 %v242_v14, %v195_v12  ;;  %v152_v17 = vpop.f32.mrb[1].mxu0  ;;  %v168_v18 = vpop.f32.mrb[1].mxu1 }
  0xf7   :  { %v153_v19 = vadd.f32 %v195_v12, %v152_v17  ;;  %v169_v20 = vadd.f32 %v195_v12, %v168_v18  ;;  %v239_v21 = vpop.f32.mrb[2].mxu0  ;;  %v243_v22 = vpop.f32.mrb[2].mxu1 }
  0xf8   :  { %185 = vst [vmem:[%s358_s3 + $0x10] sm:$0xff] %v161_v15  ;;  %189 = vst [vmem:[%s358_s3 + $0x30] sm:$0xff] %v177_v16  ;;  %v164_v23 = vadd.f32 %v239_v21, %v195_v12  ;;  %v180_v24 = vadd.f32 %v243_v22, %v195_v12  ;;  %v155_v25 = vpop.f32.mrb[3].mxu0  ;;  %v171_v26 = vpop.f32.mrb[3].mxu1 }
  0xf9   :  { %183 = vst [vmem:[%s358_s3] sm:$0xff] %v153_v19  ;;  %187 = vst [vmem:[%s358_s3 + $0x20] sm:$0xff] %v169_v20  ;;  %v156_v27 = vadd.f32 %v195_v12, %v155_v25  ;;  %v172_v28 = vadd.f32 %v195_v12, %v171_v26 }
  0xfa   :  { %186 = vst [vmem:[%s358_s3 + $0x18] sm:$0xff] %v164_v23  ;;  %190 = vst [vmem:[%s358_s3 + $0x38] sm:$0xff] %v180_v24 }
  0xfb   :  { %184 = vst [vmem:[%s358_s3 + $0x8] sm:$0xff] %v156_v27  ;;  %188 = vst [vmem:[%s358_s3 + $0x28] sm:$0xff] %v172_v28 }

// kernel: rnn_model_forward.3
= control target key start
LH: loop header
LB: loop body
LE: loop exit
PB: predicated region body
PF: predicated region fallthrough
CT: control target
= control target key end

     0   :  { %v1178_v0 = vmov 0.0   ;;  %vm1179_vm0 = vmmov 0   ;;  %v1180_v2 = vmov 0   ;;  %vm135_vm1 = vcmask 1041408   ;;  %s1496_s2 = inlined_call_operand.vmem [shape: bf16[128,128], index: 2, kind: input, shape index: {}]   ;;  %s1497_s1 = inlined_call_operand.vmem [shape: bf16[4,128], index: 1, kind: input, shape index: {}]   ;;  %s1498_s0 = inlined_call_operand.vmem [shape: bf16[8,8,4], index: 0, kind: input, shape index: {}]   ;;  %s1499_s3 = inlined_call_operand.vmem [shape: f32[1,128], index: 3, kind: input, shape index: {}]   ;;  %s1500_s4 = inlined_call_operand.vmem [shape: bf16[8,8,128], index: 4, kind: output, shape index: {}]  }
   0x1   :  { %943 = vmatprep.subr.bf16.mxu0 %v1178_v0  ;;  %v1210_v1 = vld [vmem:[%s1496_s2] sm:$0xff]   ;;  %963 = vmatprep.subr.bf16.mxu1 %v1178_v0  ;;  %22 = vst [vmem:[#allocation2] sm:$0xf] %v1180_v2  ;;  %v1221_v3 = vld [vmem:[%s1496_s2 + $0x8] sm:$0xff]   ;;  %v1228_v4 = vld [vmem:[%s1496_s2 + $0x10] sm:$0xff]   ;;  %vm131_vm2 = vcmask 31744  }
   0x2   :  { %965 = vmatprep.mubr.msk.bf16.mxu1 %vm1179_vm0, %v1178_v0  ;;  %959 = vmatprep.mubr.msk.bf16.mxu0 %vm1179_vm0, %v1178_v0  ;;  %v23_v5 = vld [vmem:[%s1497_s1] sm:$0x3]  ;;  %v1244_v8 = vld [vmem:[%s1496_s2 + $0x18] sm:$0xff]   ;;  %v1265_v10 = vld [vmem:[%s1496_s2 + $0x28] sm:$0xff]  }
   0x3   :  { %944 = vmatpush3.bf16.msra.mxu0 %v1210_v1  ;;  %v1234_v6 = vsel %vm135_vm1, %v23_v5, 0  ;;  %v42_v7 = vld [vmem:[%s1498_s0] sm:$0xf]  ;;  %v1274_v11 = vld [vmem:[%s1496_s2 + $0x30] sm:$0xff]   ;;  %v1283_v12 = vld [vmem:[%s1496_s2 + $0x38] sm:$0xff]  }
   0x4   :  { %945 = vmatprep.subr.bf16.mxu0 %v1178_v0  ;;  %964 = vmatpush3.bf16.msra.mxu1 %v1234_v6  ;;  %v1256_v9 = vld [vmem:[%s1496_s2 + $0x20] sm:$0xff]   ;;  %v837_v32 = vld [vmem:[%s1498_s0 + $0x8] sm:$0xf]  ;;  %v840_v45 = vld [vmem:[%s1498_s0 + $0xc] sm:$0xf] }
   0x5   :  { %969 = vmatprep.subr.bf16.mxu1 %v1178_v0  ;;  %v834_v14 = vld [vmem:[%s1498_s0 + $0x4] sm:$0xf]  ;;  %v1312_v19 = vld [vmem:[%s1499_s3] ss:$0 sm:$0xff]  ;;  %v843_v58 = vld [vmem:[%s1498_s0 + $0x10] sm:$0xf] }
   0x7   :  { %946 = vmatpush3.bf16.msra.mxu0 %v1221_v3  ;;  %966 = vmatmul.mubr.msk.bf16.vlgmr.msra.gmra.mrb[0].mxu1 %vm131_vm2, %v42_v7 }
   0x8   :  { %947 = vmatprep.subr.bf16.mxu0 %v1178_v0  ;;  %970 = vmatpush3.bf16.msra.mxu1 %v1210_v1  ;;  %v41_v13 = vld [vmem:[#allocation2] sm:$0xf] }
   0x9   :  { %985 = vmatprep.mubr.msk.bf16.mxu1 %vm1179_vm0, %v1178_v0  ;;  %971 = vmatprep.subr.bf16.mxu1 %v1178_v0 }
   0xb   :  { %948 = vmatpush3.bf16.msra.mxu0 %v1228_v4 }
   0xc   :  { %949 = vmatprep.subr.bf16.mxu0 %v1178_v0  ;;  %972 = vmatpush3.bf16.msra.mxu1 %v1221_v3 }
   0xd   :  { %973 = vmatprep.subr.bf16.mxu1 %v1178_v0 }
   0xf   :  { %950 = vmatpush3.bf16.msra.mxu0 %v1244_v8 }
  0x10   :  { %951 = vmatprep.subr.bf16.mxu0 %v1178_v0  ;;  %974 = vmatpush3.bf16.msra.mxu1 %v1228_v4 }
  0x11   :  { %975 = vmatprep.subr.bf16.mxu1 %v1178_v0 }
  0x13   :  { %952 = vmatpush3.bf16.msra.mxu0 %v1256_v9 }
  0x14   :  { %953 = vmatprep.subr.bf16.mxu0 %v1178_v0  ;;  %976 = vmatpush3.bf16.msra.mxu1 %v1244_v8 }
  0x15   :  { %977 = vmatprep.subr.bf16.mxu1 %v1178_v0 }
  0x17   :  { %954 = vmatpush3.bf16.msra.mxu0 %v1265_v10 }
  0x18   :  { %955 = vmatprep.subr.bf16.mxu0 %v1178_v0  ;;  %978 = vmatpush3.bf16.msra.mxu1 %v1256_v9 }
  0x19   :  { %979 = vmatprep.subr.bf16.mxu1 %v1178_v0 }
  0x1b   :  { %956 = vmatpush3.bf16.msra.mxu0 %v1274_v11 }
  0x1c   :  { %957 = vmatprep.subr.bf16.mxu0 %v1178_v0  ;;  %980 = vmatpush3.bf16.msra.mxu1 %v1265_v10 }
  0x1d   :  { %981 = vmatprep.subr.bf16.mxu1 %v1178_v0 }
  0x1f   :  { %958 = vmatpush3.bf16.msra.mxu0 %v1283_v12 }
  0x20   :  { %989 = vmatprep.subr.bf16.mxu0 %v1178_v0  ;;  %982 = vmatpush3.bf16.msra.mxu1 %v1274_v11 }
  0x21   :  { %983 = vmatprep.subr.bf16.mxu1 %v1178_v0 }
  0x22   :  { %960 = vmatmul.mubr.bf16.vlgmr.msra.gmra.mrb[0].mxu0 %v41_v13 }
  0x23   :  { %990 = vmatpush3.bf16.msra.mxu0 %v1234_v6  ;;  %991 = vmatprep.mubr.msk.bf16.mxu0 %vm1179_vm0, %v1178_v0 }
  0x24   :  { %1015 = vmatprep.subr.bf16.mxu0 %v1178_v0  ;;  %984 = vmatpush3.bf16.msra.mxu1 %v1283_v12 }
  0x25   :  { %995 = vmatprep.subr.bf16.mxu1 %v1178_v0 }
  0x2a   :  { %992 = vmatmul.mubr.msk.bf16.vlgmr.msra.gmra.mrb[4].mxu0 %vm131_vm2, %v834_v14 }
  0x2b   :  { %1016 = vmatpush3.bf16.msra.mxu0 %v1234_v6  ;;  %1017 = vmatprep.mubr.msk.bf16.mxu0 %vm1179_vm0, %v1178_v0 }
  0x2c   :  { %1021 = vmatprep.subr.bf16.mxu0 %v1178_v0 }
  0x32   :  { %1018 = vmatmul.mubr.msk.bf16.vlgmr.msra.gmra.mrb[8].mxu0 %vm131_vm2, %v837_v32 }
  0x33   :  { %1022 = vmatpush3.bf16.msra.mxu0 %v1210_v1  ;;  %1037 = vmatprep.mubr.msk.bf16.mxu0 %vm1179_vm0, %v1178_v0 }
  0x34   :  { %1023 = vmatprep.subr.bf16.mxu0 %v1178_v0 }
  0x37   :  { %1024 = vmatpush3.bf16.msra.mxu0 %v1221_v3 }
  0x38   :  { %1025 = vmatprep.subr.bf16.mxu0 %v1178_v0 }
  0x3b   :  { %1026 = vmatpush3.bf16.msra.mxu0 %v1228_v4 }
  0x3c   :  { %1027 = vmatprep.subr.bf16.mxu0 %v1178_v0 }
  0x3f   :  { %1028 = vmatpush3.bf16.msra.mxu0 %v1244_v8 }
  0x40   :  { %1029 = vmatprep.subr.bf16.mxu0 %v1178_v0 }
  0x43   :  { %1030 = vmatpush3.bf16.msra.mxu0 %v1256_v9 }
  0x44   :  { %1031 = vmatprep.subr.bf16.mxu0 %v1178_v0 }
  0x47   :  { %1032 = vmatpush3.bf16.msra.mxu0 %v1265_v10 }
  0x48   :  { %1033 = vmatprep.subr.bf16.mxu0 %v1178_v0 }
  0x4b   :  { %1034 = vmatpush3.bf16.msra.mxu0 %v1274_v11 }
  0x4c   :  { %1035 = vmatprep.subr.bf16.mxu0 %v1178_v0 }
  0x4f   :  { %1036 = vmatpush3.bf16.msra.mxu0 %v1283_v12 }
  0x50   :  { %1067 = vmatprep.subr.bf16.mxu0 %v1178_v0 }
  0xda   :  { %v173_v15 = vpop.f32.mrb[0].mxu1 }
  0xdb   :  { %v967_v16 = vpop.f32.mrb[1].mxu1 }
  0xdc   :  { %v176_v17 = vpop.f32.mrb[2].mxu1 }
  0xdd   :  { %v968_v18 = vpop.f32.mrb[3].mxu1  ;;  %v846_v17 = vld [vmem:[%s1498_s0 + $0x14] sm:$0xf] }
  0xf5   :  { %v125_v20 = vpop.f32.mrb[0].mxu0 }
  0xf6   :  { %v174_v21 = vadd.f32 %v173_v15, %v125_v20  ;;  %v961_v22 = vpop.f32.mrb[1].mxu0 }
  0xf7   :  { %v128_v23 = vpop.f32.mrb[2].mxu0 }
  0xf8   :  { %v185_v24 = vadd.f32 %v1312_v19, %v174_v21  ;;  %v962_v25 = vpop.f32.mrb[3].mxu0 }
  0xfa   :  { %1162 = vtanh.f32 %v185_v24 }
  0xfd   :  { %v268_v28 = vpop.f32.mrb[4].mxu0 }
  0xfe   :  { %v993_v29 = vpop.f32.mrb[5].mxu0 }
  0xff   :  { %v271_v30 = vpop.f32.mrb[6].mxu0 }
 0x100   :  { %v994_v31 = vpop.f32.mrb[7].mxu0 }
 0x101   :  { %v849_v31 = vld [vmem:[%s1498_s0 + $0x18] sm:$0xf] }
 0x104   :  { %v1163_v26 = vpop.eup %1162 }
 0x105   :  { %v187_v27 = vpack.c.bf16 %v1163_v26, %v1163_v26  ;;  %v358_v41 = vpop.f32.mrb[8].mxu0 }
 0x106   :  { %v1019_v42 = vpop.f32.mrb[9].mxu0 }
 0x107   :  { %188 = vst [vmem:[%s1500_s4] sm:$0xf] %v187_v27  ;;  %986 = vmatmul.mubr.bf16.vlgmr.msra.gmra.mrb[4].mxu1 %v187_v27  ;;  %v361_v43 = vpop.f32.mrb[10].mxu0 }
 0x108   :  { %996 = vmatpush3.bf16.msra.mxu1 %v1210_v1  ;;  %1011 = vmatprep.mubr.msk.bf16.mxu1 %vm1179_vm0, %v1178_v0  ;;  %v1020_v44 = vpop.f32.mrb[11].mxu0 }
 0x109   :  { %997 = vmatprep.subr.bf16.mxu1 %v1178_v0 }
 0x10c   :  { %998 = vmatpush3.bf16.msra.mxu1 %v1221_v3 }
 0x10d   :  { %999 = vmatprep.subr.bf16.mxu1 %v1178_v0 }
 0x110   :  { %1000 = vmatpush3.bf16.msra.mxu1 %v1228_v4 }
 0x111   :  { %1001 = vmatprep.subr.bf16.mxu1 %v1178_v0 }
 0x114   :  { %1002 = vmatpush3.bf16.msra.mxu1 %v1244_v8 }
 0x115   :  { %1003 = vmatprep.subr.bf16.mxu1 %v1178_v0 }
 0x118   :  { %1004 = vmatpush3.bf16.msra.mxu1 %v1256_v9 }
 0x119   :  { %1005 = vmatprep.subr.bf16.mxu1 %v1178_v0 }
 0x11c   :  { %1006 = vmatpush3.bf16.msra.mxu1 %v1265_v10 }
 0x11d   :  { %1007 = vmatprep.subr.bf16.mxu1 %v1178_v0 }
 0x120   :  { %1008 = vmatpush3.bf16.msra.mxu1 %v1274_v11 }
 0x121   :  { %1009 = vmatprep.subr.bf16.mxu1 %v1178_v0 }
 0x124   :  { %1010 = vmatpush3.bf16.msra.mxu1 %v1283_v12 }
 0x125   :  { %1041 = vmatprep.subr.bf16.mxu1 %v1178_v0 }
 0x1da   :  { %v225_v33 = vpop.f32.mrb[4].mxu1 }
 0x1db   :  { %v269_v34 = vadd.f32 %v268_v28, %v225_v33  ;;  %v987_v35 = vpop.f32.mrb[5].mxu1 }
 0x1dc   :  { %v228_v36 = vpop.f32.mrb[6].mxu1 }
 0x1dd   :  { %v274_v37 = vadd.f32 %v1312_v19, %v269_v34  ;;  %v988_v38 = vpop.f32.mrb[7].mxu1  ;;  %v852_v36 = vld [vmem:[%s1498_s0 + $0x1c] sm:$0xf] }
 0x1df   :  { %1164 = vtanh.f32 %v274_v37 }
 0x1e9   :  { %v1165_v39 = vpop.eup %1164 }
 0x1ea   :  { %v276_v40 = vpack.c.bf16 %v1165_v39, %v1165_v39 }
 0x1ec   :  { %836 = vst [vmem:[%s1500_s4 + $0x4] sm:$0xf] %v276_v40  ;;  %1012 = vmatmul.mubr.bf16.vlgmr.msra.gmra.mrb[8].mxu1 %v276_v40 }
 0x1ed   :  { %1042 = vmatpush3.bf16.msra.mxu1 %v1234_v6  ;;  %1043 = vmatprep.mubr.msk.bf16.mxu1 %vm1179_vm0, %v1178_v0 }
 0x1ee   :  { %1047 = vmatprep.subr.bf16.mxu1 %v1178_v0 }
 0x1f4   :  { %1044 = vmatmul.mubr.msk.bf16.vlgmr.msra.gmra.mrb[12].mxu1 %vm131_vm2, %v840_v45 }
 0x1f5   :  { %1048 = vmatpush3.bf16.msra.mxu1 %v1210_v1  ;;  %1063 = vmatprep.mubr.msk.bf16.mxu1 %vm1179_vm0, %v1178_v0 }
 0x1f6   :  { %1049 = vmatprep.subr.bf16.mxu1 %v1178_v0 }
 0x1f9   :  { %1050 = vmatpush3.bf16.msra.mxu1 %v1221_v3 }
 0x1fa   :  { %1051 = vmatprep.subr.bf16.mxu1 %v1178_v0 }
 0x1fd   :  { %1052 = vmatpush3.bf16.msra.mxu1 %v1228_v4 }
 0x1fe   :  { %1053 = vmatprep.subr.bf16.mxu1 %v1178_v0 }
 0x201   :  { %1054 = vmatpush3.bf16.msra.mxu1 %v1244_v8 }
 0x202   :  { %1055 = vmatprep.subr.bf16.mxu1 %v1178_v0 }
 0x205   :  { %1056 = vmatpush3.bf16.msra.mxu1 %v1256_v9 }
 0x206   :  { %1057 = vmatprep.subr.bf16.mxu1 %v1178_v0 }
 0x209   :  { %1058 = vmatpush3.bf16.msra.mxu1 %v1265_v10 }
 0x20a   :  { %1059 = vmatprep.subr.bf16.mxu1 %v1178_v0 }
 0x20d   :  { %1060 = vmatpush3.bf16.msra.mxu1 %v1274_v11 }
 0x20e   :  { %1061 = vmatprep.subr.bf16.mxu1 %v1178_v0 }
 0x211   :  { %1062 = vmatpush3.bf16.msra.mxu1 %v1283_v12 }
 0x212   :  { %1093 = vmatprep.subr.bf16.mxu1 %v1178_v0 }
 0x2bf   :  { %v315_v46 = vpop.f32.mrb[8].mxu1 }
 0x2c0   :  { %v359_v47 = vadd.f32 %v358_v41, %v315_v46  ;;  %v1013_v48 = vpop.f32.mrb[9].mxu1 }
 0x2c1   :  { %v318_v49 = vpop.f32.mrb[10].mxu1 }
 0x2c2   :  { %v364_v50 = vadd.f32 %v1312_v19, %v359_v47  ;;  %v1014_v51 = vpop.f32.mrb[11].mxu1 }
 0x2c4   :  { %1166 = vtanh.f32 %v364_v50 }
 0x2c7   :  { %v448_v54 = vpop.f32.mrb[12].mxu1 }
 0x2c8   :  { %v1045_v55 = vpop.f32.mrb[13].mxu1 }
 0x2c9   :  { %v451_v56 = vpop.f32.mrb[14].mxu1 }
 0x2ca   :  { %v1046_v57 = vpop.f32.mrb[15].mxu1 }
 0x2ce   :  { %v1167_v52 = vpop.eup %1166 }
 0x2cf   :  { %v366_v53 = vpack.c.bf16 %v1167_v52, %v1167_v52 }
 0x2d1   :  { %839 = vst [vmem:[%s1500_s4 + $0x8] sm:$0xf] %v366_v53  ;;  %1038 = vmatmul.mubr.bf16.vlgmr.msra.gmra.mrb[12].mxu0 %v366_v53 }
 0x2d2   :  { %1068 = vmatpush3.bf16.msra.mxu0 %v1234_v6  ;;  %1069 = vmatprep.mubr.msk.bf16.mxu0 %vm1179_vm0, %v1178_v0 }
 0x2d3   :  { %1073 = vmatprep.subr.bf16.mxu0 %v1178_v0 }
 0x2d9   :  { %1070 = vmatmul.mubr.msk.bf16.vlgmr.msra.gmra.mrb[16].mxu0 %vm131_vm2, %v843_v58 }
 0x2da   :  { %1074 = vmatpush3.bf16.msra.mxu0 %v1210_v1  ;;  %1089 = vmatprep.mubr.msk.bf16.mxu0 %vm1179_vm0, %v1178_v0 }
 0x2db   :  { %1075 = vmatprep.subr.bf16.mxu0 %v1178_v0 }
 0x2de   :  { %1076 = vmatpush3.bf16.msra.mxu0 %v1221_v3 }
 0x2df   :  { %1077 = vmatprep.subr.bf16.mxu0 %v1178_v0 }
 0x2e2   :  { %1078 = vmatpush3.bf16.msra.mxu0 %v1228_v4 }
 0x2e3   :  { %1079 = vmatprep.subr.bf16.mxu0 %v1178_v0 }
 0x2e6   :  { %1080 = vmatpush3.bf16.msra.mxu0 %v1244_v8 }
 0x2e7   :  { %1081 = vmatprep.subr.bf16.mxu0 %v1178_v0 }
 0x2ea   :  { %1082 = vmatpush3.bf16.msra.mxu0 %v1256_v9 }
 0x2eb   :  { %1083 = vmatprep.subr.bf16.mxu0 %v1178_v0 }
 0x2ee   :  { %1084 = vmatpush3.bf16.msra.mxu0 %v1265_v10 }
 0x2ef   :  { %1085 = vmatprep.subr.bf16.mxu0 %v1178_v0 }
 0x2f2   :  { %1086 = vmatpush3.bf16.msra.mxu0 %v1274_v11 }
 0x2f3   :  { %1087 = vmatprep.subr.bf16.mxu0 %v1178_v0 }
 0x2f6   :  { %1088 = vmatpush3.bf16.msra.mxu0 %v1283_v12 }
 0x2f7   :  { %1119 = vmatprep.subr.bf16.mxu0 %v1178_v0 }
 0x3a4   :  { %v405_v59 = vpop.f32.mrb[12].mxu0 }
 0x3a5   :  { %v449_v60 = vadd.f32 %v448_v54, %v405_v59  ;;  %v1039_v61 = vpop.f32.mrb[13].mxu0 }
 0x3a6   :  { %v408_v62 = vpop.f32.mrb[14].mxu0 }
 0x3a7   :  { %v454_v63 = vadd.f32 %v1312_v19, %v449_v60  ;;  %v1040_v2 = vpop.f32.mrb[15].mxu0 }
 0x3a9   :  { %1168 = vtanh.f32 %v454_v63 }
 0x3ac   :  { %v538_v13 = vpop.f32.mrb[16].mxu0 }
 0x3ad   :  { %v1071_v14 = vpop.f32.mrb[17].mxu0 }
 0x3ae   :  { %v541_v15 = vpop.f32.mrb[18].mxu0 }
 0x3af   :  { %v1072_v16 = vpop.f32.mrb[19].mxu0 }
 0x3b3   :  { %v1169_v5 = vpop.eup %1168 }
 0x3b4   :  { %v456_v7 = vpack.c.bf16 %v1169_v5, %v1169_v5 }
 0x3b6   :  { %842 = vst [vmem:[%s1500_s4 + $0xc] sm:$0xf] %v456_v7  ;;  %1064 = vmatmul.mubr.bf16.vlgmr.msra.gmra.mrb[16].mxu1 %v456_v7 }
 0x3b7   :  { %1094 = vmatpush3.bf16.msra.mxu1 %v1234_v6  ;;  %1095 = vmatprep.mubr.msk.bf16.mxu1 %vm1179_vm0, %v1178_v0 }
 0x3b8   :  { %1099 = vmatprep.subr.bf16.mxu1 %v1178_v0 }
 0x3be   :  { %1096 = vmatmul.mubr.msk.bf16.vlgmr.msra.gmra.mrb[20].mxu1 %vm131_vm2, %v846_v17 }
 0x3bf   :  { %1100 = vmatpush3.bf16.msra.mxu1 %v1210_v1  ;;  %1115 = vmatprep.mubr.msk.bf16.mxu1 %vm1179_vm0, %v1178_v0 }
 0x3c0   :  { %1101 = vmatprep.subr.bf16.mxu1 %v1178_v0 }
 0x3c3   :  { %1102 = vmatpush3.bf16.msra.mxu1 %v1221_v3 }
 0x3c4   :  { %1103 = vmatprep.subr.bf16.mxu1 %v1178_v0 }
 0x3c7   :  { %1104 = vmatpush3.bf16.msra.mxu1 %v1228_v4 }
 0x3c8   :  { %1105 = vmatprep.subr.bf16.mxu1 %v1178_v0 }
 0x3cb   :  { %1106 = vmatpush3.bf16.msra.mxu1 %v1244_v8 }
 0x3cc   :  { %1107 = vmatprep.subr.bf16.mxu1 %v1178_v0 }
 0x3cf   :  { %1108 = vmatpush3.bf16.msra.mxu1 %v1256_v9 }
 0x3d0   :  { %1109 = vmatprep.subr.bf16.mxu1 %v1178_v0 }
 0x3d3   :  { %1110 = vmatpush3.bf16.msra.mxu1 %v1265_v10 }
 0x3d4   :  { %1111 = vmatprep.subr.bf16.mxu1 %v1178_v0 }
 0x3d7   :  { %1112 = vmatpush3.bf16.msra.mxu1 %v1274_v11 }
 0x3d8   :  { %1113 = vmatprep.subr.bf16.mxu1 %v1178_v0 }
 0x3db   :  { %1114 = vmatpush3.bf16.msra.mxu1 %v1283_v12 }
 0x3dc   :  { %1145 = vmatprep.subr.bf16.mxu1 %v1178_v0 }
 0x489   :  { %v495_v18 = vpop.f32.mrb[16].mxu1 }
 0x48a   :  { %v539_v20 = vadd.f32 %v538_v13, %v495_v18  ;;  %v1065_v21 = vpop.f32.mrb[17].mxu1 }
 0x48b   :  { %v498_v22 = vpop.f32.mrb[18].mxu1 }
 0x48c   :  { %v544_v23 = vadd.f32 %v1312_v19, %v539_v20  ;;  %v1066_v24 = vpop.f32.mrb[19].mxu1 }
 0x48e   :  { %1170 = vtanh.f32 %v544_v23 }
 0x491   :  { %v628_v27 = vpop.f32.mrb[20].mxu1 }
 0x492   :  { %v1097_v28 = vpop.f32.mrb[21].mxu1 }
 0x493   :  { %v631_v29 = vpop.f32.mrb[22].mxu1 }
 0x494   :  { %v1098_v30 = vpop.f32.mrb[23].mxu1 }
 0x498   :  { %v1171_v25 = vpop.eup %1170 }
 0x499   :  { %v546_v26 = vpack.c.bf16 %v1171_v25, %v1171_v25 }
 0x49b   :  { %845 = vst [vmem:[%s1500_s4 + $0x10] sm:$0xf] %v546_v26  ;;  %1090 = vmatmul.mubr.bf16.vlgmr.msra.gmra.mrb[20].mxu0 %v546_v26 }
 0x49c   :  { %1120 = vmatpush3.bf16.msra.mxu0 %v1234_v6  ;;  %1121 = vmatprep.mubr.msk.bf16.mxu0 %vm1179_vm0, %v1178_v0 }
 0x49d   :  { %1125 = vmatprep.subr.bf16.mxu0 %v1178_v0 }
 0x4a3   :  { %1122 = vmatmul.mubr.msk.bf16.vlgmr.msra.gmra.mrb[24].mxu0 %vm131_vm2, %v849_v31 }
 0x4a4   :  { %1126 = vmatpush3.bf16.msra.mxu0 %v1210_v1  ;;  %1141 = vmatprep.mubr.msk.bf16.mxu0 %vm1179_vm0, %v1178_v0 }
 0x4a5   :  { %1127 = vmatprep.subr.bf16.mxu0 %v1178_v0 }
 0x4a8   :  { %1128 = vmatpush3.bf16.msra.mxu0 %v1221_v3 }
 0x4a9   :  { %1129 = vmatprep.subr.bf16.mxu0 %v1178_v0 }
 0x4ac   :  { %1130 = vmatpush3.bf16.msra.mxu0 %v1228_v4 }
 0x4ad   :  { %1131 = vmatprep.subr.bf16.mxu0 %v1178_v0 }
 0x4b0   :  { %1132 = vmatpush3.bf16.msra.mxu0 %v1244_v8 }
 0x4b1   :  { %1133 = vmatprep.subr.bf16.mxu0 %v1178_v0 }
 0x4b4   :  { %1134 = vmatpush3.bf16.msra.mxu0 %v1256_v9 }
 0x4b5   :  { %1135 = vmatprep.subr.bf16.mxu0 %v1178_v0 }
 0x4b8   :  { %1136 = vmatpush3.bf16.msra.mxu0 %v1265_v10 }
 0x4b9   :  { %1137 = vmatprep.subr.bf16.mxu0 %v1178_v0 }
 0x4bc   :  { %1138 = vmatpush3.bf16.msra.mxu0 %v1274_v11 }
 0x4bd   :  { %1139 = vmatprep.subr.bf16.mxu0 %v1178_v0 }
 0x4c0   :  { %1140 = vmatpush3.bf16.msra.mxu0 %v1283_v12 }
 0x56e   :  { %v585_v1 = vpop.f32.mrb[20].mxu0 }
 0x56f   :  { %v629_v3 = vadd.f32 %v628_v27, %v585_v1  ;;  %v1091_v4 = vpop.f32.mrb[21].mxu0 }
 0x570   :  { %v588_v8 = vpop.f32.mrb[22].mxu0 }
 0x571   :  { %v634_v32 = vadd.f32 %v1312_v19, %v629_v3  ;;  %v1092_v33 = vpop.f32.mrb[23].mxu0 }
 0x573   :  { %1172 = vtanh.f32 %v634_v32 }
 0x576   :  { %v718_v10 = vpop.f32.mrb[24].mxu0 }
 0x577   :  { %v1123_v11 = vpop.f32.mrb[25].mxu0 }
 0x578   :  { %v721_v12 = vpop.f32.mrb[26].mxu0 }
 0x579   :  { %v1124_v35 = vpop.f32.mrb[27].mxu0 }
 0x57d   :  { %v1173_v9 = vpop.eup %1172 }
 0x57e   :  { %v636_v34 = vpack.c.bf16 %v1173_v9, %v1173_v9 }
 0x580   :  { %848 = vst [vmem:[%s1500_s4 + $0x14] sm:$0xf] %v636_v34  ;;  %1116 = vmatmul.mubr.bf16.vlgmr.msra.gmra.mrb[24].mxu1 %v636_v34 }
 0x581   :  { %1146 = vmatpush3.bf16.msra.mxu1 %v1234_v6  ;;  %1147 = vmatprep.mubr.msk.bf16.mxu1 %vm1179_vm0, %v1178_v0 }
 0x588   :  { %1148 = vmatmul.mubr.msk.bf16.vlgmr.msra.gmra.mrb[28].mxu1 %vm131_vm2, %v852_v36 }
 0x653   :  { %v675_v37 = vpop.f32.mrb[24].mxu1 }
 0x654   :  { %v719_v38 = vadd.f32 %v718_v10, %v675_v37  ;;  %v1117_v39 = vpop.f32.mrb[25].mxu1 }
 0x655   :  { %v678_v40 = vpop.f32.mrb[26].mxu1 }
 0x656   :  { %v724_v41 = vadd.f32 %v1312_v19, %v719_v38  ;;  %v1118_v6 = vpop.f32.mrb[27].mxu1 }
 0x658   :  { %1174 = vtanh.f32 %v724_v41 }
 0x65b   :  { %v808_v43 = vpop.f32.mrb[28].mxu1 }
 0x65c   :  { %v1149_v44 = vpop.f32.mrb[29].mxu1 }
 0x65d   :  { %v811_v45 = vpop.f32.mrb[30].mxu1 }
 0x65e   :  { %v1150_v46 = vpop.f32.mrb[31].mxu1 }
 0x662   :  { %v1175_v42 = vpop.eup %1174 }
 0x663   :  { %v726_v0 = vpack.c.bf16 %v1175_v42, %v1175_v42 }
 0x665   :  { %851 = vst [vmem:[%s1500_s4 + $0x18] sm:$0xf] %v726_v0  ;;  %1142 = vmatmul.mubr.bf16.vlgmr.msra.gmra.mrb[28].mxu0 %v726_v0 }
 0x738   :  { %v765_v47 = vpop.f32.mrb[28].mxu0 }
 0x739   :  { %v809_v48 = vadd.f32 %v808_v43, %v765_v47  ;;  %v1143_v49 = vpop.f32.mrb[29].mxu0 }
 0x73a   :  { %v768_v50 = vpop.f32.mrb[30].mxu0 }
 0x73b   :  { %v814_v51 = vadd.f32 %v1312_v19, %v809_v48  ;;  %v1144_v52 = vpop.f32.mrb[31].mxu0 }
 0x73d   :  { %1176 = vtanh.f32 %v814_v51 }
 0x747   :  { %v1177_v53 = vpop.eup %1176 }
 0x748   :  { %v816_v54 = vpack.c.bf16 %v1177_v53, %v1177_v53 }
 0x74a   :  { %854 = vst [vmem:[%s1500_s4 + $0x1c] sm:$0xf] %v816_v54  ;;  %819 = vst [vmem:[#allocation2] sm:$0xf] %v816_v54 }

// kernel: rnn_model_forward.4
= control target key start
LH: loop header
LB: loop body
LE: loop exit
PB: predicated region body
PF: predicated region fallthrough
CT: control target
= control target key end

     0   :  { %v1388_v0 = vmov 0.0   ;;  %v1389_v2 = vmov 0   ;;  %vm1390_vm0 = vmmov 0   ;;  %s1845_s2 = inlined_call_operand.vmem [shape: bf16[128,128], index: 2, kind: input, shape index: {}]   ;;  %s1846_s1 = inlined_call_operand.vmem [shape: bf16[128,128], index: 1, kind: input, shape index: {}]   ;;  %s1847_s0 = inlined_call_operand.vmem [shape: bf16[8,8,128], index: 0, kind: input, shape index: {}]   ;;  %s1848_s3 = inlined_call_operand.vmem [shape: f32[1,128], index: 3, kind: input, shape index: {}]   ;;  %s1849_s4 = inlined_call_operand.vmem [shape: bf16[8,8,128], index: 4, kind: output, shape index: {}]  }
   0x1   :  { %1033 = vmatprep.subr.bf16.mxu0 %v1388_v0  ;;  %1053 = vmatprep.subr.bf16.mxu1 %v1388_v0  ;;  %v1421_v1 = vld [vmem:[%s1845_s2] sm:$0xff]   ;;  %22 = vst [vmem:[#allocation2] sm:$0xf] %v1389_v2  ;;  %v1436_v4 = vld [vmem:[%s1845_s2 + $0x8] sm:$0xff]   ;;  %v1450_v6 = vld [vmem:[%s1845_s2 + $0x10] sm:$0xff]  }
   0x2   :  { %v1426_v3 = vld [vmem:[%s1846_s1] sm:$0xff]   ;;  %1049 = vmatprep.mubr.msk.bf16.mxu0 %vm1390_vm0, %v1388_v0  ;;  %1069 = vmatprep.mubr.msk.bf16.mxu1 %vm1390_vm0, %v1388_v0  ;;  %v1443_v5 = vld [vmem:[%s1846_s1 + $0x8] sm:$0xff]   ;;  %v1457_v7 = vld [vmem:[%s1846_s1 + $0x10] sm:$0xff]  }
   0x3   :  { %1034 = vmatpush3.bf16.msra.mxu0 %v1421_v1  ;;  %1054 = vmatpush3.bf16.msra.mxu1 %v1426_v3  ;;  %v1464_v8 = vld [vmem:[%s1845_s2 + $0x18] sm:$0xff]   ;;  %v1478_v10 = vld [vmem:[%s1845_s2 + $0x20] sm:$0xff]   ;;  %v1492_v12 = vld [vmem:[%s1845_s2 + $0x28] sm:$0xff]  }
   0x4   :  { %1035 = vmatprep.subr.bf16.mxu0 %v1388_v0  ;;  %1055 = vmatprep.subr.bf16.mxu1 %v1388_v0  ;;  %v1471_v9 = vld [vmem:[%s1846_s1 + $0x18] sm:$0xff]   ;;  %v1485_v11 = vld [vmem:[%s1846_s1 + $0x20] sm:$0xff]   ;;  %v1499_v13 = vld [vmem:[%s1846_s1 + $0x28] sm:$0xff]  }
   0x5   :  { %v1506_v14 = vld [vmem:[%s1845_s2 + $0x30] sm:$0xff]   ;;  %v1520_v16 = vld [vmem:[%s1845_s2 + $0x38] sm:$0xff]   ;;  %v57_v19 = vld [vmem:[%s1847_s0] sm:$0xf] }
   0x6   :  { %v1513_v15 = vld [vmem:[%s1846_s1 + $0x30] sm:$0xff]   ;;  %v1527_v17 = vld [vmem:[%s1846_s1 + $0x38] sm:$0xff]   ;;  %v875_v20 = vld [vmem:[%s1847_s0 + $0x4] sm:$0xf] }
   0x7   :  { %1036 = vmatpush3.bf16.msra.mxu0 %v1436_v4  ;;  %1056 = vmatpush3.bf16.msra.mxu1 %v1443_v5  ;;  %v1597_v22 = vld [vmem:[%s1848_s3] ss:$0 sm:$0xff]  ;;  %v877_v38 = vld [vmem:[%s1847_s0 + $0x8] sm:$0xf]  ;;  %v879_v51 = vld [vmem:[%s1847_s0 + $0xc] sm:$0xf] }
   0x8   :  { %1037 = vmatprep.subr.bf16.mxu0 %v1388_v0  ;;  %1057 = vmatprep.subr.bf16.mxu1 %v1388_v0  ;;  %v56_v18 = vld [vmem:[#allocation2] sm:$0xf]  ;;  %v881_v2 = vld [vmem:[%s1847_s0 + $0x10] sm:$0xf] }
   0xb   :  { %1038 = vmatpush3.bf16.msra.mxu0 %v1450_v6  ;;  %1058 = vmatpush3.bf16.msra.mxu1 %v1457_v7 }
   0xc   :  { %1039 = vmatprep.subr.bf16.mxu0 %v1388_v0  ;;  %1059 = vmatprep.subr.bf16.mxu1 %v1388_v0 }
   0xf   :  { %1040 = vmatpush3.bf16.msra.mxu0 %v1464_v8  ;;  %1060 = vmatpush3.bf16.msra.mxu1 %v1471_v9 }
  0x10   :  { %1041 = vmatprep.subr.bf16.mxu0 %v1388_v0  ;;  %1061 = vmatprep.subr.bf16.mxu1 %v1388_v0 }
  0x13   :  { %1042 = vmatpush3.bf16.msra.mxu0 %v1478_v10  ;;  %1062 = vmatpush3.bf16.msra.mxu1 %v1485_v11 }
  0x14   :  { %1043 = vmatprep.subr.bf16.mxu0 %v1388_v0  ;;  %1063 = vmatprep.subr.bf16.mxu1 %v1388_v0 }
  0x17   :  { %1044 = vmatpush3.bf16.msra.mxu0 %v1492_v12  ;;  %1064 = vmatpush3.bf16.msra.mxu1 %v1499_v13 }
  0x18   :  { %1045 = vmatprep.subr.bf16.mxu0 %v1388_v0  ;;  %1065 = vmatprep.subr.bf16.mxu1 %v1388_v0 }
  0x1b   :  { %1046 = vmatpush3.bf16.msra.mxu0 %v1506_v14  ;;  %1066 = vmatpush3.bf16.msra.mxu1 %v1513_v15 }
  0x1c   :  { %1047 = vmatprep.subr.bf16.mxu0 %v1388_v0  ;;  %1067 = vmatprep.subr.bf16.mxu1 %v1388_v0 }
  0x1f   :  { %1048 = vmatpush3.bf16.msra.mxu0 %v1520_v16  ;;  %1068 = vmatpush3.bf16.msra.mxu1 %v1527_v17 }
  0x20   :  { %1073 = vmatprep.subr.bf16.mxu0 %v1388_v0  ;;  %1093 = vmatprep.subr.bf16.mxu1 %v1388_v0 }
  0x22   :  { %1050 = vmatmul.mubr.bf16.vlgmr.msra.gmra.mrb[0].mxu0 %v56_v18  ;;  %1070 = vmatmul.mubr.bf16.vlgmr.msra.gmra.mrb[0].mxu1 %v57_v19 }
  0x23   :  { %1074 = vmatpush3.bf16.msra.mxu0 %v1421_v1  ;;  %1094 = vmatpush3.bf16.msra.mxu1 %v1426_v3 }
  0x24   :  { %1075 = vmatprep.subr.bf16.mxu0 %v1388_v0  ;;  %1095 = vmatprep.subr.bf16.mxu1 %v1388_v0 }
  0x25   :  { %1109 = vmatprep.mubr.msk.bf16.mxu1 %vm1390_vm0, %v1388_v0  ;;  %1089 = vmatprep.mubr.msk.bf16.mxu0 %vm1390_vm0, %v1388_v0 }
  0x27   :  { %1076 = vmatpush3.bf16.msra.mxu0 %v1436_v4  ;;  %1096 = vmatpush3.bf16.msra.mxu1 %v1443_v5 }
  0x28   :  { %1077 = vmatprep.subr.bf16.mxu0 %v1388_v0  ;;  %1097 = vmatprep.subr.bf16.mxu1 %v1388_v0 }
  0x2b   :  { %1078 = vmatpush3.bf16.msra.mxu0 %v1450_v6  ;;  %1098 = vmatpush3.bf16.msra.mxu1 %v1457_v7 }
  0x2c   :  { %1079 = vmatprep.subr.bf16.mxu0 %v1388_v0  ;;  %1099 = vmatprep.subr.bf16.mxu1 %v1388_v0 }
  0x2f   :  { %1080 = vmatpush3.bf16.msra.mxu0 %v1464_v8  ;;  %1100 = vmatpush3.bf16.msra.mxu1 %v1471_v9 }
  0x30   :  { %1081 = vmatprep.subr.bf16.mxu0 %v1388_v0  ;;  %1101 = vmatprep.subr.bf16.mxu1 %v1388_v0 }
  0x33   :  { %1082 = vmatpush3.bf16.msra.mxu0 %v1478_v10  ;;  %1102 = vmatpush3.bf16.msra.mxu1 %v1485_v11 }
  0x34   :  { %1083 = vmatprep.subr.bf16.mxu0 %v1388_v0  ;;  %1103 = vmatprep.subr.bf16.mxu1 %v1388_v0 }
  0x37   :  { %1084 = vmatpush3.bf16.msra.mxu0 %v1492_v12  ;;  %1104 = vmatpush3.bf16.msra.mxu1 %v1499_v13 }
  0x38   :  { %1085 = vmatprep.subr.bf16.mxu0 %v1388_v0  ;;  %1105 = vmatprep.subr.bf16.mxu1 %v1388_v0 }
  0x3b   :  { %1086 = vmatpush3.bf16.msra.mxu0 %v1506_v14  ;;  %1106 = vmatpush3.bf16.msra.mxu1 %v1513_v15 }
  0x3c   :  { %1087 = vmatprep.subr.bf16.mxu0 %v1388_v0  ;;  %1107 = vmatprep.subr.bf16.mxu1 %v1388_v0 }
  0x3f   :  { %1088 = vmatpush3.bf16.msra.mxu0 %v1520_v16  ;;  %1108 = vmatpush3.bf16.msra.mxu1 %v1527_v17 }
  0x40   :  { %1113 = vmatprep.subr.bf16.mxu0 %v1388_v0  ;;  %1133 = vmatprep.subr.bf16.mxu1 %v1388_v0 }
  0x42   :  { %1110 = vmatmul.mubr.bf16.vlgmr.msra.gmra.mrb[4].mxu1 %v875_v20 }
  0x43   :  { %1134 = vmatpush3.bf16.msra.mxu1 %v1426_v3  ;;  %1149 = vmatprep.mubr.msk.bf16.mxu1 %vm1390_vm0, %v1388_v0 }
  0x44   :  { %1135 = vmatprep.subr.bf16.mxu1 %v1388_v0 }
  0x47   :  { %1136 = vmatpush3.bf16.msra.mxu1 %v1443_v5 }
  0x48   :  { %1137 = vmatprep.subr.bf16.mxu1 %v1388_v0 }
  0x4b   :  { %1138 = vmatpush3.bf16.msra.mxu1 %v1457_v7 }
  0x4c   :  { %1139 = vmatprep.subr.bf16.mxu1 %v1388_v0 }
  0x4f   :  { %1140 = vmatpush3.bf16.msra.mxu1 %v1471_v9 }
  0x50   :  { %1141 = vmatprep.subr.bf16.mxu1 %v1388_v0 }
  0x53   :  { %1142 = vmatpush3.bf16.msra.mxu1 %v1485_v11 }
  0x54   :  { %1143 = vmatprep.subr.bf16.mxu1 %v1388_v0 }
  0x57   :  { %1144 = vmatpush3.bf16.msra.mxu1 %v1499_v13 }
  0x58   :  { %1145 = vmatprep.subr.bf16.mxu1 %v1388_v0 }
  0x5b   :  { %1146 = vmatpush3.bf16.msra.mxu1 %v1513_v15 }
  0x5c   :  { %1147 = vmatprep.subr.bf16.mxu1 %v1388_v0 }
  0x5f   :  { %1148 = vmatpush3.bf16.msra.mxu1 %v1527_v17 }
  0x60   :  { %1173 = vmatprep.subr.bf16.mxu1 %v1388_v0 }
  0x62   :  { %1150 = vmatmul.mubr.bf16.vlgmr.msra.gmra.mrb[8].mxu1 %v877_v38 }
  0x63   :  { %1174 = vmatpush3.bf16.msra.mxu1 %v1426_v3  ;;  %1189 = vmatprep.mubr.msk.bf16.mxu1 %vm1390_vm0, %v1388_v0 }
  0x64   :  { %1175 = vmatprep.subr.bf16.mxu1 %v1388_v0 }
  0x67   :  { %1176 = vmatpush3.bf16.msra.mxu1 %v1443_v5 }
  0x68   :  { %1177 = vmatprep.subr.bf16.mxu1 %v1388_v0 }
  0x6b   :  { %1178 = vmatpush3.bf16.msra.mxu1 %v1457_v7 }
  0x6c   :  { %1179 = vmatprep.subr.bf16.mxu1 %v1388_v0 }
  0x6f   :  { %1180 = vmatpush3.bf16.msra.mxu1 %v1471_v9 }
  0x70   :  { %1181 = vmatprep.subr.bf16.mxu1 %v1388_v0 }
  0x73   :  { %1182 = vmatpush3.bf16.msra.mxu1 %v1485_v11 }
  0x74   :  { %1183 = vmatprep.subr.bf16.mxu1 %v1388_v0 }
  0x77   :  { %1184 = vmatpush3.bf16.msra.mxu1 %v1499_v13 }
  0x78   :  { %1185 = vmatprep.subr.bf16.mxu1 %v1388_v0 }
  0x7b   :  { %1186 = vmatpush3.bf16.msra.mxu1 %v1513_v15 }
  0x7c   :  { %1187 = vmatprep.subr.bf16.mxu1 %v1388_v0 }
  0x7f   :  { %1188 = vmatpush3.bf16.msra.mxu1 %v1527_v17 }
  0x80   :  { %1213 = vmatprep.subr.bf16.mxu1 %v1388_v0 }
  0x82   :  { %1190 = vmatmul.mubr.bf16.vlgmr.msra.gmra.mrb[12].mxu1 %v879_v51 }
  0x83   :  { %1214 = vmatpush3.bf16.msra.mxu1 %v1426_v3  ;;  %1229 = vmatprep.mubr.msk.bf16.mxu1 %vm1390_vm0, %v1388_v0 }
  0x84   :  { %1215 = vmatprep.subr.bf16.mxu1 %v1388_v0 }
  0x87   :  { %1216 = vmatpush3.bf16.msra.mxu1 %v1443_v5 }
  0x88   :  { %1217 = vmatprep.subr.bf16.mxu1 %v1388_v0 }
  0x8b   :  { %1218 = vmatpush3.bf16.msra.mxu1 %v1457_v7 }
  0x8c   :  { %1219 = vmatprep.subr.bf16.mxu1 %v1388_v0 }
  0x8f   :  { %1220 = vmatpush3.bf16.msra.mxu1 %v1471_v9 }
  0x90   :  { %1221 = vmatprep.subr.bf16.mxu1 %v1388_v0 }
  0x93   :  { %1222 = vmatpush3.bf16.msra.mxu1 %v1485_v11 }
  0x94   :  { %1223 = vmatprep.subr.bf16.mxu1 %v1388_v0 }
  0x97   :  { %1224 = vmatpush3.bf16.msra.mxu1 %v1499_v13 }
  0x98   :  { %1225 = vmatprep.subr.bf16.mxu1 %v1388_v0 }
  0x9b   :  { %1226 = vmatpush3.bf16.msra.mxu1 %v1513_v15 }
  0x9c   :  { %1227 = vmatprep.subr.bf16.mxu1 %v1388_v0 }
  0x9f   :  { %1228 = vmatpush3.bf16.msra.mxu1 %v1527_v17 }
  0xa0   :  { %1253 = vmatprep.subr.bf16.mxu1 %v1388_v0 }
  0xa2   :  { %1230 = vmatmul.mubr.bf16.vlgmr.msra.gmra.mrb[16].mxu1 %v881_v2 }
  0xa3   :  { %1254 = vmatpush3.bf16.msra.mxu1 %v1426_v3  ;;  %1269 = vmatprep.mubr.msk.bf16.mxu1 %vm1390_vm0, %v1388_v0 }
  0xa4   :  { %1255 = vmatprep.subr.bf16.mxu1 %v1388_v0 }
  0xa7   :  { %1256 = vmatpush3.bf16.msra.mxu1 %v1443_v5 }
  0xa8   :  { %1257 = vmatprep.subr.bf16.mxu1 %v1388_v0 }
  0xab   :  { %1258 = vmatpush3.bf16.msra.mxu1 %v1457_v7 }
  0xac   :  { %1259 = vmatprep.subr.bf16.mxu1 %v1388_v0 }
  0xaf   :  { %1260 = vmatpush3.bf16.msra.mxu1 %v1471_v9 }
  0xb0   :  { %1261 = vmatprep.subr.bf16.mxu1 %v1388_v0 }
  0xb3   :  { %1262 = vmatpush3.bf16.msra.mxu1 %v1485_v11 }
  0xb4   :  { %1263 = vmatprep.subr.bf16.mxu1 %v1388_v0 }
  0xb7   :  { %1264 = vmatpush3.bf16.msra.mxu1 %v1499_v13 }
  0xb8   :  { %1265 = vmatprep.subr.bf16.mxu1 %v1388_v0 }
  0xbb   :  { %1266 = vmatpush3.bf16.msra.mxu1 %v1513_v15 }
  0xbc   :  { %1267 = vmatprep.subr.bf16.mxu1 %v1388_v0 }
  0xbf   :  { %1268 = vmatpush3.bf16.msra.mxu1 %v1527_v17 }
  0xc0   :  { %1293 = vmatprep.subr.bf16.mxu1 %v1388_v0 }
  0xf5   :  { %v140_v21 = vpop.f32.mrb[0].mxu0  ;;  %v228_v23 = vpop.f32.mrb[0].mxu1 }
  0xf6   :  { %v1051_v24 = vpop.f32.mrb[1].mxu0  ;;  %v229_v25 = vadd.f32 %v228_v23, %v140_v21  ;;  %v1071_v26 = vpop.f32.mrb[1].mxu1 }
  0xf7   :  { %v143_v27 = vpop.f32.mrb[2].mxu0  ;;  %v231_v28 = vpop.f32.mrb[2].mxu1 }
  0xf8   :  { %v1052_v29 = vpop.f32.mrb[3].mxu0  ;;  %v240_v30 = vadd.f32 %v1597_v22, %v229_v25  ;;  %v1072_v31 = vpop.f32.mrb[3].mxu1 }
  0xf9   :  { %v883_v31 = vld [vmem:[%s1847_s0 + $0x14] sm:$0xf] }
  0xfa   :  { %1372 = vtanh.f32 %v240_v30  ;;  %1270 = vmatmul.mubr.bf16.vlgmr.msra.gmra.mrb[20].mxu1 %v883_v31 }
  0xfb   :  { %1294 = vmatpush3.bf16.msra.mxu1 %v1426_v3  ;;  %1309 = vmatprep.mubr.msk.bf16.mxu1 %vm1390_vm0, %v1388_v0 }
  0xfc   :  { %1295 = vmatprep.subr.bf16.mxu1 %v1388_v0 }
  0xff   :  { %1296 = vmatpush3.bf16.msra.mxu1 %v1443_v5 }
 0x100   :  { %1297 = vmatprep.subr.bf16.mxu1 %v1388_v0 }
 0x103   :  { %1298 = vmatpush3.bf16.msra.mxu1 %v1457_v7 }
 0x104   :  { %v1373_v32 = vpop.eup %1372  ;;  %1299 = vmatprep.subr.bf16.mxu1 %v1388_v0 }
 0x105   :  { %v242_v33 = vpack.c.bf16 %v1373_v32, %v1373_v32 }
 0x107   :  { %243 = vst [vmem:[%s1849_s4] sm:$0xf] %v242_v33  ;;  %1090 = vmatmul.mubr.bf16.vlgmr.msra.gmra.mrb[4].mxu0 %v242_v33  ;;  %1300 = vmatpush3.bf16.msra.mxu1 %v1471_v9 }
 0x108   :  { %1114 = vmatpush3.bf16.msra.mxu0 %v1421_v1  ;;  %1129 = vmatprep.mubr.msk.bf16.mxu0 %vm1390_vm0, %v1388_v0 }
 0x109   :  { %1115 = vmatprep.subr.bf16.mxu0 %v1388_v0  ;;  %1301 = vmatprep.subr.bf16.mxu1 %v1388_v0 }
 0x10b   :  { %1302 = vmatpush3.bf16.msra.mxu1 %v1485_v11 }
 0x10c   :  { %1116 = vmatpush3.bf16.msra.mxu0 %v1436_v4  ;;  %1303 = vmatprep.subr.bf16.mxu1 %v1388_v0 }
 0x10d   :  { %1117 = vmatprep.subr.bf16.mxu0 %v1388_v0 }
 0x10f   :  { %1304 = vmatpush3.bf16.msra.mxu1 %v1499_v13 }
 0x110   :  { %1118 = vmatpush3.bf16.msra.mxu0 %v1450_v6  ;;  %1305 = vmatprep.subr.bf16.mxu1 %v1388_v0 }
 0x111   :  { %1119 = vmatprep.subr.bf16.mxu0 %v1388_v0 }
 0x113   :  { %1306 = vmatpush3.bf16.msra.mxu1 %v1513_v15 }
 0x114   :  { %1120 = vmatpush3.bf16.msra.mxu0 %v1464_v8  ;;  %1307 = vmatprep.subr.bf16.mxu1 %v1388_v0 }
 0x115   :  { %1121 = vmatprep.subr.bf16.mxu0 %v1388_v0  ;;  %v320_v34 = vpop.f32.mrb[4].mxu1 }
 0x116   :  { %v1111_v35 = vpop.f32.mrb[5].mxu1 }
 0x117   :  { %v323_v36 = vpop.f32.mrb[6].mxu1  ;;  %1308 = vmatpush3.bf16.msra.mxu1 %v1527_v17 }
 0x118   :  { %1122 = vmatpush3.bf16.msra.mxu0 %v1478_v10  ;;  %v1112_v37 = vpop.f32.mrb[7].mxu1  ;;  %1333 = vmatprep.subr.bf16.mxu1 %v1388_v0 }
 0x119   :  { %1123 = vmatprep.subr.bf16.mxu0 %v1388_v0 }
 0x11c   :  { %1124 = vmatpush3.bf16.msra.mxu0 %v1492_v12 }
 0x11d   :  { %1125 = vmatprep.subr.bf16.mxu0 %v1388_v0 }
 0x120   :  { %1126 = vmatpush3.bf16.msra.mxu0 %v1506_v14 }
 0x121   :  { %1127 = vmatprep.subr.bf16.mxu0 %v1388_v0 }
 0x124   :  { %1128 = vmatpush3.bf16.msra.mxu0 %v1520_v16 }
 0x125   :  { %1153 = vmatprep.subr.bf16.mxu0 %v1388_v0 }
 0x135   :  { %v407_v47 = vpop.f32.mrb[8].mxu1 }
 0x136   :  { %v1151_v48 = vpop.f32.mrb[9].mxu1 }
 0x137   :  { %v410_v49 = vpop.f32.mrb[10].mxu1 }
 0x138   :  { %v1152_v50 = vpop.f32.mrb[11].mxu1 }
 0x155   :  { %v494_v60 = vpop.f32.mrb[12].mxu1 }
 0x156   :  { %v1191_v61 = vpop.f32.mrb[13].mxu1 }
 0x157   :  { %v497_v62 = vpop.f32.mrb[14].mxu1 }
 0x158   :  { %v1192_v63 = vpop.f32.mrb[15].mxu1 }
 0x175   :  { %v581_v27 = vpop.f32.mrb[16].mxu1 }
 0x176   :  { %v1231_v28 = vpop.f32.mrb[17].mxu1 }
 0x177   :  { %v584_v29 = vpop.f32.mrb[18].mxu1 }
 0x178   :  { %v1232_v30 = vpop.f32.mrb[19].mxu1 }
 0x1da   :  { %v280_v39 = vpop.f32.mrb[4].mxu0 }
 0x1db   :  { %v321_v40 = vadd.f32 %v320_v34, %v280_v39  ;;  %v1091_v41 = vpop.f32.mrb[5].mxu0 }
 0x1dc   :  { %v283_v42 = vpop.f32.mrb[6].mxu0 }
 0x1dd   :  { %v326_v43 = vadd.f32 %v1597_v22, %v321_v40  ;;  %v1092_v44 = vpop.f32.mrb[7].mxu0  ;;  %v668_v40 = vpop.f32.mrb[20].mxu1 }
 0x1de   :  { %v1271_v41 = vpop.f32.mrb[21].mxu1  ;;  %v885_v44 = vld [vmem:[%s1847_s0 + $0x18] sm:$0xf] }
 0x1df   :  { %1374 = vtanh.f32 %v326_v43  ;;  %v671_v42 = vpop.f32.mrb[22].mxu1  ;;  %1310 = vmatmul.mubr.bf16.vlgmr.msra.gmra.mrb[24].mxu1 %v885_v44 }
 0x1e0   :  { %v1272_v43 = vpop.f32.mrb[23].mxu1  ;;  %1334 = vmatpush3.bf16.msra.mxu1 %v1426_v3  ;;  %1349 = vmatprep.mubr.msk.bf16.mxu1 %vm1390_vm0, %v1388_v0 }
 0x1e1   :  { %1335 = vmatprep.subr.bf16.mxu1 %v1388_v0 }
 0x1e4   :  { %1336 = vmatpush3.bf16.msra.mxu1 %v1443_v5 }
 0x1e5   :  { %1337 = vmatprep.subr.bf16.mxu1 %v1388_v0 }
 0x1e8   :  { %1338 = vmatpush3.bf16.msra.mxu1 %v1457_v7 }
 0x1e9   :  { %v1375_v45 = vpop.eup %1374  ;;  %1339 = vmatprep.subr.bf16.mxu1 %v1388_v0 }
 0x1ea   :  { %v328_v46 = vpack.c.bf16 %v1375_v45, %v1375_v45 }
 0x1ec   :  { %876 = vst [vmem:[%s1849_s4 + $0x4] sm:$0xf] %v328_v46  ;;  %1130 = vmatmul.mubr.bf16.vlgmr.msra.gmra.mrb[8].mxu0 %v328_v46  ;;  %1340 = vmatpush3.bf16.msra.mxu1 %v1471_v9 }
 0x1ed   :  { %1154 = vmatpush3.bf16.msra.mxu0 %v1421_v1  ;;  %1169 = vmatprep.mubr.msk.bf16.mxu0 %vm1390_vm0, %v1388_v0 }
 0x1ee   :  { %1155 = vmatprep.subr.bf16.mxu0 %v1388_v0  ;;  %1341 = vmatprep.subr.bf16.mxu1 %v1388_v0 }
 0x1f0   :  { %1342 = vmatpush3.bf16.msra.mxu1 %v1485_v11 }
 0x1f1   :  { %1156 = vmatpush3.bf16.msra.mxu0 %v1436_v4  ;;  %1343 = vmatprep.subr.bf16.mxu1 %v1388_v0 }
 0x1f2   :  { %1157 = vmatprep.subr.bf16.mxu0 %v1388_v0 }
 0x1f4   :  { %1344 = vmatpush3.bf16.msra.mxu1 %v1499_v13 }
 0x1f5   :  { %1158 = vmatpush3.bf16.msra.mxu0 %v1450_v6  ;;  %1345 = vmatprep.subr.bf16.mxu1 %v1388_v0 }
 0x1f6   :  { %1159 = vmatprep.subr.bf16.mxu0 %v1388_v0 }
 0x1f8   :  { %1346 = vmatpush3.bf16.msra.mxu1 %v1513_v15 }
 0x1f9   :  { %1160 = vmatpush3.bf16.msra.mxu0 %v1464_v8  ;;  %1347 = vmatprep.subr.bf16.mxu1 %v1388_v0 }
 0x1fa   :  { %1161 = vmatprep.subr.bf16.mxu0 %v1388_v0 }
 0x1fc   :  { %1348 = vmatpush3.bf16.msra.mxu1 %v1527_v17 }
 0x1fd   :  { %1162 = vmatpush3.bf16.msra.mxu0 %v1478_v10 }
 0x1fe   :  { %1163 = vmatprep.subr.bf16.mxu0 %v1388_v0 }
 0x201   :  { %1164 = vmatpush3.bf16.msra.mxu0 %v1492_v12 }
 0x202   :  { %1165 = vmatprep.subr.bf16.mxu0 %v1388_v0 }
 0x205   :  { %1166 = vmatpush3.bf16.msra.mxu0 %v1506_v14 }
 0x206   :  { %1167 = vmatprep.subr.bf16.mxu0 %v1388_v0 }
 0x209   :  { %1168 = vmatpush3.bf16.msra.mxu0 %v1520_v16 }
 0x20a   :  { %1193 = vmatprep.subr.bf16.mxu0 %v1388_v0 }
 0x2bf   :  { %v367_v52 = vpop.f32.mrb[8].mxu0 }
 0x2c0   :  { %v408_v53 = vadd.f32 %v407_v47, %v367_v52  ;;  %v1131_v54 = vpop.f32.mrb[9].mxu0 }
 0x2c1   :  { %v370_v55 = vpop.f32.mrb[10].mxu0 }
 0x2c2   :  { %v413_v56 = vadd.f32 %v1597_v22, %v408_v53  ;;  %v1132_v57 = vpop.f32.mrb[11].mxu0 }
 0x2c4   :  { %1376 = vtanh.f32 %v413_v56 }
 0x2ce   :  { %v1377_v58 = vpop.eup %1376 }
 0x2cf   :  { %v415_v59 = vpack.c.bf16 %v1377_v58, %v1377_v58 }
 0x2d1   :  { %878 = vst [vmem:[%s1849_s4 + $0x8] sm:$0xf] %v415_v59  ;;  %1170 = vmatmul.mubr.bf16.vlgmr.msra.gmra.mrb[12].mxu0 %v415_v59 }
 0x2d2   :  { %1194 = vmatpush3.bf16.msra.mxu0 %v1421_v1  ;;  %1209 = vmatprep.mubr.msk.bf16.mxu0 %vm1390_vm0, %v1388_v0 }
 0x2d3   :  { %1195 = vmatprep.subr.bf16.mxu0 %v1388_v0 }
 0x2d6   :  { %1196 = vmatpush3.bf16.msra.mxu0 %v1436_v4 }
 0x2d7   :  { %1197 = vmatprep.subr.bf16.mxu0 %v1388_v0 }
 0x2da   :  { %1198 = vmatpush3.bf16.msra.mxu0 %v1450_v6 }
 0x2db   :  { %1199 = vmatprep.subr.bf16.mxu0 %v1388_v0 }
 0x2de   :  { %1200 = vmatpush3.bf16.msra.mxu0 %v1464_v8 }
 0x2df   :  { %1201 = vmatprep.subr.bf16.mxu0 %v1388_v0 }
 0x2e2   :  { %1202 = vmatpush3.bf16.msra.mxu0 %v1478_v10 }
 0x2e3   :  { %1203 = vmatprep.subr.bf16.mxu0 %v1388_v0 }
 0x2e6   :  { %1204 = vmatpush3.bf16.msra.mxu0 %v1492_v12 }
 0x2e7   :  { %1205 = vmatprep.subr.bf16.mxu0 %v1388_v0 }
 0x2ea   :  { %1206 = vmatpush3.bf16.msra.mxu0 %v1506_v14 }
 0x2eb   :  { %1207 = vmatprep.subr.bf16.mxu0 %v1388_v0 }
 0x2ee   :  { %1208 = vmatpush3.bf16.msra.mxu0 %v1520_v16 }
 0x2ef   :  { %1233 = vmatprep.subr.bf16.mxu0 %v1388_v0 }
 0x3a4   :  { %v454_v18 = vpop.f32.mrb[12].mxu0 }
 0x3a5   :  { %v495_v19 = vadd.f32 %v494_v60, %v454_v18  ;;  %v1171_v20 = vpop.f32.mrb[13].mxu0 }
 0x3a6   :  { %v457_v21 = vpop.f32.mrb[14].mxu0 }
 0x3a7   :  { %v500_v23 = vadd.f32 %v1597_v22, %v495_v19  ;;  %v1172_v24 = vpop.f32.mrb[15].mxu0 }
 0x3a9   :  { %1378 = vtanh.f32 %v500_v23 }
 0x3b3   :  { %v1379_v25 = vpop.eup %1378 }
 0x3b4   :  { %v502_v26 = vpack.c.bf16 %v1379_v25, %v1379_v25 }
 0x3b6   :  { %880 = vst [vmem:[%s1849_s4 + $0xc] sm:$0xf] %v502_v26  ;;  %1210 = vmatmul.mubr.bf16.vlgmr.msra.gmra.mrb[16].mxu0 %v502_v26 }
 0x3b7   :  { %1234 = vmatpush3.bf16.msra.mxu0 %v1421_v1  ;;  %1249 = vmatprep.mubr.msk.bf16.mxu0 %vm1390_vm0, %v1388_v0 }
 0x3b8   :  { %1235 = vmatprep.subr.bf16.mxu0 %v1388_v0 }
 0x3bb   :  { %1236 = vmatpush3.bf16.msra.mxu0 %v1436_v4 }
 0x3bc   :  { %1237 = vmatprep.subr.bf16.mxu0 %v1388_v0 }
 0x3bf   :  { %1238 = vmatpush3.bf16.msra.mxu0 %v1450_v6 }
 0x3c0   :  { %1239 = vmatprep.subr.bf16.mxu0 %v1388_v0 }
 0x3c3   :  { %1240 = vmatpush3.bf16.msra.mxu0 %v1464_v8 }
 0x3c4   :  { %1241 = vmatprep.subr.bf16.mxu0 %v1388_v0 }
 0x3c7   :  { %1242 = vmatpush3.bf16.msra.mxu0 %v1478_v10 }
 0x3c8   :  { %1243 = vmatprep.subr.bf16.mxu0 %v1388_v0 }
 0x3cb   :  { %1244 = vmatpush3.bf16.msra.mxu0 %v1492_v12 }
 0x3cc   :  { %1245 = vmatprep.subr.bf16.mxu0 %v1388_v0 }
 0x3cf   :  { %1246 = vmatpush3.bf16.msra.mxu0 %v1506_v14 }
 0x3d0   :  { %1247 = vmatprep.subr.bf16.mxu0 %v1388_v0 }
 0x3d3   :  { %1248 = vmatpush3.bf16.msra.mxu0 %v1520_v16 }
 0x3d4   :  { %1273 = vmatprep.subr.bf16.mxu0 %v1388_v0 }
 0x489   :  { %v541_v32 = vpop.f32.mrb[16].mxu0 }
 0x48a   :  { %v582_v33 = vadd.f32 %v581_v27, %v541_v32  ;;  %v1211_v34 = vpop.f32.mrb[17].mxu0 }
 0x48b   :  { %v544_v35 = vpop.f32.mrb[18].mxu0 }
 0x48c   :  { %v587_v36 = vadd.f32 %v1597_v22, %v582_v33  ;;  %v1212_v37 = vpop.f32.mrb[19].mxu0 }
 0x48e   :  { %1380 = vtanh.f32 %v587_v36 }
 0x498   :  { %v1381_v38 = vpop.eup %1380 }
 0x499   :  { %v589_v39 = vpack.c.bf16 %v1381_v38, %v1381_v38 }
 0x49b   :  { %882 = vst [vmem:[%s1849_s4 + $0x10] sm:$0xf] %v589_v39  ;;  %1250 = vmatmul.mubr.bf16.vlgmr.msra.gmra.mrb[20].mxu0 %v589_v39 }
 0x49c   :  { %1274 = vmatpush3.bf16.msra.mxu0 %v1421_v1  ;;  %1289 = vmatprep.mubr.msk.bf16.mxu0 %vm1390_vm0, %v1388_v0 }
 0x49d   :  { %1275 = vmatprep.subr.bf16.mxu0 %v1388_v0 }
 0x4a0   :  { %1276 = vmatpush3.bf16.msra.mxu0 %v1436_v4 }
 0x4a1   :  { %1277 = vmatprep.subr.bf16.mxu0 %v1388_v0 }
 0x4a4   :  { %1278 = vmatpush3.bf16.msra.mxu0 %v1450_v6 }
 0x4a5   :  { %1279 = vmatprep.subr.bf16.mxu0 %v1388_v0 }
 0x4a8   :  { %1280 = vmatpush3.bf16.msra.mxu0 %v1464_v8 }
 0x4a9   :  { %1281 = vmatprep.subr.bf16.mxu0 %v1388_v0 }
 0x4ac   :  { %1282 = vmatpush3.bf16.msra.mxu0 %v1478_v10 }
 0x4ad   :  { %1283 = vmatprep.subr.bf16.mxu0 %v1388_v0 }
 0x4b0   :  { %1284 = vmatpush3.bf16.msra.mxu0 %v1492_v12 }
 0x4b1   :  { %1285 = vmatprep.subr.bf16.mxu0 %v1388_v0 }
 0x4b4   :  { %1286 = vmatpush3.bf16.msra.mxu0 %v1506_v14 }
 0x4b5   :  { %1287 = vmatprep.subr.bf16.mxu0 %v1388_v0 }
 0x4b8   :  { %1288 = vmatpush3.bf16.msra.mxu0 %v1520_v16 }
 0x4b9   :  { %1313 = vmatprep.subr.bf16.mxu0 %v1388_v0 }
 0x56e   :  { %v628_v3 = vpop.f32.mrb[20].mxu0 }
 0x56f   :  { %v669_v5 = vadd.f32 %v668_v40, %v628_v3  ;;  %v1251_v7 = vpop.f32.mrb[21].mxu0 }
 0x570   :  { %v631_v9 = vpop.f32.mrb[22].mxu0 }
 0x571   :  { %v674_v45 = vadd.f32 %v1597_v22, %v669_v5  ;;  %v1252_v46 = vpop.f32.mrb[23].mxu0 }
 0x573   :  { %1382 = vtanh.f32 %v674_v45 }
 0x57d   :  { %v1383_v11 = vpop.eup %1382 }
 0x57e   :  { %v676_v47 = vpack.c.bf16 %v1383_v11, %v1383_v11 }
 0x580   :  { %884 = vst [vmem:[%s1849_s4 + $0x14] sm:$0xf] %v676_v47  ;;  %1290 = vmatmul.mubr.bf16.vlgmr.msra.gmra.mrb[24].mxu0 %v676_v47 }
 0x581   :  { %1314 = vmatpush3.bf16.msra.mxu0 %v1421_v1  ;;  %1329 = vmatprep.mubr.msk.bf16.mxu0 %vm1390_vm0, %v1388_v0  ;;  %v755_v1 = vpop.f32.mrb[24].mxu1 }
 0x582   :  { %1315 = vmatprep.subr.bf16.mxu0 %v1388_v0 }
 0x585   :  { %1316 = vmatpush3.bf16.msra.mxu0 %v1436_v4  ;;  %v1311_v4 = vpop.f32.mrb[25].mxu1 }
 0x586   :  { %1317 = vmatprep.subr.bf16.mxu0 %v1388_v0 }
 0x589   :  { %1318 = vmatpush3.bf16.msra.mxu0 %v1450_v6  ;;  %v758_v6 = vpop.f32.mrb[26].mxu1 }
 0x58a   :  { %1319 = vmatprep.subr.bf16.mxu0 %v1388_v0 }
 0x58d   :  { %1320 = vmatpush3.bf16.msra.mxu0 %v1464_v8  ;;  %v1312_v8 = vpop.f32.mrb[27].mxu1 }
 0x58e   :  { %1321 = vmatprep.subr.bf16.mxu0 %v1388_v0 }
 0x591   :  { %1322 = vmatpush3.bf16.msra.mxu0 %v1478_v10  ;;  %v887_v10 = vld [vmem:[%s1847_s0 + $0x1c] sm:$0xf] }
 0x592   :  { %1323 = vmatprep.subr.bf16.mxu0 %v1388_v0  ;;  %1350 = vmatmul.mubr.bf16.vlgmr.msra.gmra.mrb[28].mxu1 %v887_v10 }
 0x595   :  { %1324 = vmatpush3.bf16.msra.mxu0 %v1492_v12 }
 0x596   :  { %1325 = vmatprep.subr.bf16.mxu0 %v1388_v0 }
 0x599   :  { %1326 = vmatpush3.bf16.msra.mxu0 %v1506_v14 }
 0x59a   :  { %1327 = vmatprep.subr.bf16.mxu0 %v1388_v0 }
 0x59d   :  { %1328 = vmatpush3.bf16.msra.mxu0 %v1520_v16 }
 0x653   :  { %v715_v13 = vpop.f32.mrb[24].mxu0 }
 0x654   :  { %v756_v15 = vadd.f32 %v755_v1, %v715_v13  ;;  %v1291_v12 = vpop.f32.mrb[25].mxu0 }
 0x655   :  { %v718_v17 = vpop.f32.mrb[26].mxu0 }
 0x656   :  { %v761_v48 = vadd.f32 %v1597_v22, %v756_v15  ;;  %v1292_v14 = vpop.f32.mrb[27].mxu0 }
 0x658   :  { %1384 = vtanh.f32 %v761_v48 }
 0x662   :  { %v1385_v0 = vpop.eup %1384 }
 0x663   :  { %v763_v49 = vpack.c.bf16 %v1385_v0, %v1385_v0 }
 0x665   :  { %886 = vst [vmem:[%s1849_s4 + $0x18] sm:$0xf] %v763_v49  ;;  %1330 = vmatmul.mubr.bf16.vlgmr.msra.gmra.mrb[28].mxu0 %v763_v49  ;;  %v842_v16 = vpop.f32.mrb[28].mxu1 }
 0x666   :  { %v1351_v50 = vpop.f32.mrb[29].mxu1 }
 0x667   :  { %v845_v51 = vpop.f32.mrb[30].mxu1 }
 0x668   :  { %v1352_v52 = vpop.f32.mrb[31].mxu1 }
 0x738   :  { %v802_v53 = vpop.f32.mrb[28].mxu0 }
 0x739   :  { %v843_v54 = vadd.f32 %v842_v16, %v802_v53  ;;  %v1331_v55 = vpop.f32.mrb[29].mxu0 }
 0x73a   :  { %v805_v56 = vpop.f32.mrb[30].mxu0 }
 0x73b   :  { %v848_v57 = vadd.f32 %v1597_v22, %v843_v54  ;;  %v1332_v58 = vpop.f32.mrb[31].mxu0 }
 0x73d   :  { %1386 = vtanh.f32 %v848_v57 }
 0x747   :  { %v1387_v59 = vpop.eup %1386 }
 0x748   :  { %v850_v60 = vpack.c.bf16 %v1387_v59, %v1387_v59 }
 0x74a   :  { %888 = vst [vmem:[%s1849_s4 + $0x1c] sm:$0xf] %v850_v60  ;;  %853 = vst [vmem:[#allocation2] sm:$0xf] %v850_v60 }

</bundles_post_ra>
